<compile_context>
chip_gen: v5e
topology: v5e:2x2
jax: 0.10.0
libtpu: 0.0.40
codegen_flags: <defaults>
</compile_context>

<pallas_src>
import jax
import jax.numpy as jnp
from jax import lax
from jax.experimental import pallas as pl
from jax.experimental.pallas import tpu as pltpu


def _round_up(x, m):
    return ((x + m - 1) // m) * m


def _vae_kernel(x_ref, ubias_ref,
                we_ref, be_ref,
                whead_ref, bhead_ref,
                wd0_ref, bd0_ref,
                wd1_ref, bd1_ref,
                recon_ref, head_ref):
    # ---- F.normalize(data): x / max(||x||_2, 1e-12), via rsqrt on the EUP ----
    x = x_ref[...]                                               # (TB, M) f32
    ss = jnp.sum(x * x, axis=1, keepdims=True)                   # (TB, 1)
    inv = lax.rsqrt(jnp.maximum(ss, 1e-24))                      # == 1 / max(norm, 1e-12)
    xn = x * inv

    # ---- encoder: Dropout (identity) -> Linear -> tanh -> Dropout (identity) ----
    h = jnp.tanh(
        jnp.dot(xn.astype(jnp.bfloat16), we_ref[...],
                preferred_element_type=jnp.float32) + be_ref[...]
    )                                                            # (TB, H) f32

    # ---- fused mu | logvar head (zero-padded to lane-dense 2*LP) ----
    head = jnp.dot(h.astype(jnp.bfloat16), whead_ref[...],
                   preferred_element_type=jnp.float32) + bhead_ref[...]  # (TB, 2*LP)
    head_ref[...] = head

    # ---- reparameterize (eval mode): z = mu; padded lanes are exactly zero ----
    lp = wd0_ref.shape[0]                                        # padded latent width
    z = head[:, :lp]                                             # (TB, LP)

    # ---- decoder: Linear -> tanh -> Dropout (identity) -> Linear ----
    d = jnp.tanh(
        jnp.dot(z.astype(jnp.bfloat16), wd0_ref[...],
                preferred_element_type=jnp.float32) + bd0_ref[...]
    )                                                            # (TB, H)
    recon = jnp.dot(d.astype(jnp.bfloat16), wd1_ref[...],
                    preferred_element_type=jnp.float32) + bd1_ref[...]   # (TB, M)
    # bd1_ref already contains b_dec1 + movie_bias (folded in the wrapper).
    recon_ref[...] = recon + ubias_ref[...]                      # + user_bias[users]


def vae_forward(data, users, params, *, batch_tile=128):
    """data: (B, num_movies) f32, users: (B,) int32, params: dict of f32 weights."""
    B, M = data.shape
    H = params["w_enc"].shape[1]
    L = params["w_mu"].shape[1]
    LP = _round_up(L, 128)                      # lane-dense padded latent width

    f32, bf16 = jnp.float32, jnp.bfloat16

    # ---- wrapper-side packing (tiny; "free" relative to the kernel) ----
    # Fuse mu|logvar into one (H, 2*LP) weight; padded columns are ZERO so the
    # padded mu lanes are zero and feeding them through w_dec0_p is exact.
    w_mu_p = jnp.zeros((H, LP), f32).at[:, :L].set(params["w_mu"])
    w_lv_p = jnp.zeros((H, LP), f32).at[:, :L].set(params["w_lv"])
    b_mu_p = jnp.zeros((1, LP), f32).at[:, :L].set(params["b_mu"])
    b_lv_p = jnp.zeros((1, LP), f32).at[:, :L].set(params["b_lv"])
    w_head = jnp.concatenate([w_mu_p, w_lv_p], axis=1).astype(bf16)       # (H, 2*LP)
    b_head = jnp.concatenate([b_mu_p, b_lv_p], axis=1)                    # (1, 2*LP) f32
    w_dec0_p = (jnp.zeros((LP, H), f32).at[:L, :].set(params["w_dec0"])
                ).astype(bf16)                                            # (LP, H)
    w_enc = params["w_enc"].astype(bf16)                                  # (M, H)
    w_dec1 = params["w_dec1"].astype(bf16)                                # (H, M)
    b_out = params["b_dec1"] + params["movie_bias"]                       # (1, M) f32

    # Per-user bias gather (data-dependent, tiny) stays outside the kernel.
    # TODO(synk): fold into the kernel via PrefetchScalarGridSpec(num_scalar_prefetch=1)
    #   with `users` in SMEM if this HLO ever shows up un-hidden in profiles.
    ubias = params["user_bias"][users]                                    # (B, 1)

    # ---- pad batch to a multiple of the batch tile ----
    TB = batch_tile
    BP = _round_up(B, TB)
    if BP != B:
        data = jnp.pad(data, ((0, BP - B), (0, 0)))    # zero rows are safe: xn = 0
        ubias = jnp.pad(ubias, ((0, BP - B), (0, 0)))

    row = lambda i: (i, 0)   # batch-tiled arrays
    rep = lambda i: (0, 0)   # VMEM-resident (weights / biases)

    out_shape = (
        jax.ShapeDtypeStruct((BP, M), f32),        # recon
        jax.ShapeDtypeStruct((BP, 2 * LP), f32),   # mu | logvar (lane-dense)
    )

    recon_p, head_p = pl.pallas_call(
        _vae_kernel,
        out_shape=out_shape,
        grid_spec=pltpu.PrefetchScalarGridSpec(
            num_scalar_prefetch=0,
            grid=(BP // TB,),
            in_specs=[
                pl.BlockSpec((TB, M), row),        # data
                pl.BlockSpec((TB, 1), row),        # user_bias[users]
                pl.BlockSpec((M, H), rep),         # w_enc   (bf16, resident)
                pl.BlockSpec((1, H), rep),         # b_enc
                pl.BlockSpec((H, 2 * LP), rep),    # w_head  (bf16, resident)
                pl.BlockSpec((1, 2 * LP), rep),    # b_head
                pl.BlockSpec((LP, H), rep),        # w_dec0  (bf16, resident)
                pl.BlockSpec((1, H), rep),         # b_dec0
                pl.BlockSpec((H, M), rep),         # w_dec1  (bf16, resident)
                pl.BlockSpec((1, M), rep),         # b_dec1 + movie_bias
            ],
            out_specs=[
                pl.BlockSpec((TB, M), row),
                pl.BlockSpec((TB, 2 * LP), row),
            ],
        ),
        compiler_params=pltpu.CompilerParams(
            dimension_semantics=("parallel",),
        ),
    )(data, ubias,
      w_enc, params["b_enc"],
      w_head, b_head,
      w_dec0_p, params["b_dec0"],
      w_dec1, b_out)

    recon = recon_p[:B]
    mu = head_p[:B, :L]
    logvar = head_p[:B, LP:LP + L]
    z = mu                                   # eval-mode reparameterize
    return recon, z, mu, logvar


def init_params(key, num_movies, hidden, latent, num_users):
    """Deterministic synthetic init. Weights stored as (in_features, out_features)."""
    ks = jax.random.split(key, 10)

    def lin(kw, fan_in, fan_out):
        scale = 1.0 / jnp.sqrt(fan_in)
        return jax.random.uniform(kw, (fan_in, fan_out), jnp.float32, -scale, scale)

    return {
        "w_enc": lin(ks[0], num_movies, hidden),
        "b_enc": jax.random.normal(ks[1], (1, hidden), jnp.float32) * 0.01,
        "w_mu": lin(ks[2], hidden, latent),
        "b_mu": jax.random.normal(ks[3], (1, latent), jnp.float32) * 0.01,
        "w_lv": lin(ks[4], hidden, latent),
        "b_lv": jax.random.normal(ks[5], (1, latent), jnp.float32) * 0.01,
        "w_dec0": lin(ks[6], latent, hidden),
        "b_dec0": jax.random.normal(ks[7], (1, hidden), jnp.float32) * 0.01,
        "w_dec1": lin(ks[8], hidden, num_movies),
        "b_dec1": jax.random.normal(ks[9], (1, num_movies), jnp.float32) * 0.01,
        # user_bias / movie_bias initialized to ones, as in the PyTorch module.
        "user_bias": jnp.ones((num_users, 1), jnp.float32),
        "movie_bias": jnp.ones((1, num_movies), jnp.float32),
    }


def _ref_forward(data, users, params):
    """Pure-JAX f32 reference for correctness checking."""
    norm = jnp.sqrt(jnp.sum(data * data, axis=1, keepdims=True))
    xn = data / jnp.maximum(norm, 1e-12)
    h = jnp.tanh(xn @ params["w_enc"] + params["b_enc"])
    mu = h @ params["w_mu"] + params["b_mu"]
    logvar = h @ params["w_lv"] + params["b_lv"]
    z = mu
    d = jnp.tanh(z @ params["w_dec0"] + params["b_dec0"])
    recon = d @ params["w_dec1"] + params["b_dec1"]
    recon = recon + params["user_bias"][users] + params["movie_bias"]
    return recon, z, mu, logvar


if __name__ == "__main__":
    # Batch sized to fill MXU rows (>= 128 per tile) and exercise the batch grid.
    B, num_movies, hidden, latent, num_users = 256, 512, 128, 32, 64

    key = jax.random.PRNGKey(0)
    k_data, k_users, k_params = jax.random.split(key, 3)

    data = jax.random.uniform(k_data, (B, num_movies), jnp.float32)
    users = jax.random.randint(k_users, (B,), 0, num_users, jnp.int32)
    params = init_params(k_params, num_movies, hidden, latent, num_users)

    recon, z, mu, logvar = vae_forward(data, users, params, batch_tile=128)
    jax.block_until_ready((recon, z, mu, logvar))

    # sanity check against pure-JAX f32 reference (kernel uses bf16 MXU operands)
    r_ref, z_ref, mu_ref, lv_ref = _ref_forward(data, users, params)
    assert recon.shape == r_ref.shape and mu.shape == mu_ref.shape
    assert jnp.allclose(recon, r_ref, atol=5e-3), "recon mismatch"
    assert jnp.allclose(mu, mu_ref, atol=5e-3), "mu mismatch"
    assert jnp.allclose(logvar, lv_ref, atol=5e-3), "logvar mismatch"
    assert jnp.allclose(z, z_ref, atol=5e-3), "z mismatch"

    print("KERNEL_OK")
</pallas_src>

<mosaic_0001>
module attributes {stable_mosaic.version = 11 : i64} {
  func.func @_vae_kernel(%arg0: i32, %arg1: memref<128x512xf32, #tpu.memory_space<vmem>>, %arg2: memref<128x1xf32, #tpu.memory_space<vmem>>, %arg3: memref<512x128xbf16, #tpu.memory_space<vmem>>, %arg4: memref<1x128xf32, #tpu.memory_space<vmem>>, %arg5: memref<128x256xbf16, #tpu.memory_space<vmem>>, %arg6: memref<1x256xf32, #tpu.memory_space<vmem>>, %arg7: memref<128x128xbf16, #tpu.memory_space<vmem>>, %arg8: memref<1x128xf32, #tpu.memory_space<vmem>>, %arg9: memref<128x512xbf16, #tpu.memory_space<vmem>>, %arg10: memref<1x512xf32, #tpu.memory_space<vmem>>, %arg11: memref<128x512xf32, #tpu.memory_space<vmem>>, %arg12: memref<128x256xf32, #tpu.memory_space<vmem>>) attributes {dimension_semantics = [#tpu.dimension_semantics<parallel>], iteration_bounds = array<i64: 2>, scalar_prefetch = 0 : i64, scratch_operands = 0 : i64, tpu.core_type = #tpu.core_type<tc>, window_params = [{transform_indices = @transform_0, window_bounds = array<i64: 128, 512>}, {transform_indices = @transform_1, window_bounds = array<i64: 128, 1>}, {pipeline_mode = #tpu.pipeline_mode<synchronous>, transform_indices = @transform_2, window_bounds = array<i64: 512, 128>}, {pipeline_mode = #tpu.pipeline_mode<synchronous>, transform_indices = @transform_3, window_bounds = array<i64: 1, 128>}, {pipeline_mode = #tpu.pipeline_mode<synchronous>, transform_indices = @transform_4, window_bounds = array<i64: 128, 256>}, {pipeline_mode = #tpu.pipeline_mode<synchronous>, transform_indices = @transform_5, window_bounds = array<i64: 1, 256>}, {pipeline_mode = #tpu.pipeline_mode<synchronous>, transform_indices = @transform_6, window_bounds = array<i64: 128, 128>}, {pipeline_mode = #tpu.pipeline_mode<synchronous>, transform_indices = @transform_7, window_bounds = array<i64: 1, 128>}, {pipeline_mode = #tpu.pipeline_mode<synchronous>, transform_indices = @transform_8, window_bounds = array<i64: 128, 512>}, {pipeline_mode = #tpu.pipeline_mode<synchronous>, transform_indices = @transform_9, window_bounds = array<i64: 1, 512>}, {transform_indices = @transform_10, window_bounds = array<i64: 128, 512>}, {transform_indices = @transform_11, window_bounds = array<i64: 128, 256>}]} {
    %c0 = arith.constant 0 : index
    %c0_0 = arith.constant 0 : index
    %0 = vector.load %arg1[%c0, %c0_0] : memref<128x512xf32, #tpu.memory_space<vmem>>, vector<128x512xf32>
    %1 = arith.mulf %0, %0 : vector<128x512xf32>
    %cst = arith.constant dense<0.000000e+00> : vector<128xf32>
    %2 = vector.multi_reduction <add>, %1, %cst [1] : vector<128x512xf32> to vector<128xf32>
    %3 = vector.shape_cast %2 : vector<128xf32> to vector<128x1xf32>
    %cst_1 = arith.constant 1.000000e-24 : f32
    %4 = vector.broadcast %cst_1 : f32 to vector<128x1xf32>
    %5 = arith.maximumf %3, %4 : vector<128x1xf32>
    %6 = math.rsqrt %5 : vector<128x1xf32>
    %7 = vector.broadcast %6 : vector<128x1xf32> to vector<128x512xf32>
    %8 = arith.mulf %0, %7 : vector<128x512xf32>
    %9 = arith.truncf %8 : vector<128x512xf32> to vector<128x512xbf16>
    %c0_2 = arith.constant 0 : index
    %c0_3 = arith.constant 0 : index
    %10 = vector.load %arg3[%c0_2, %c0_3] : memref<512x128xbf16, #tpu.memory_space<vmem>>, vector<512x128xbf16>
    %cst_4 = arith.constant dense<0.000000e+00> : vector<128x128xf32>
    %11 = tpu.matmul %9, %10, %cst_4 {dimension_numbers = #tpu.dot_dimension_numbers<[1], [0], [0], [1], [0, 0, 1, 1], [], []>} : vector<128x512xbf16>, vector<512x128xbf16>, vector<128x128xf32> -> vector<128x128xf32>
    %c0_5 = arith.constant 0 : index
    %c0_6 = arith.constant 0 : index
    %12 = vector.load %arg4[%c0_5, %c0_6] : memref<1x128xf32, #tpu.memory_space<vmem>>, vector<1x128xf32>
    %13 = vector.broadcast %12 : vector<1x128xf32> to vector<128x128xf32>
    %14 = arith.addf %11, %13 : vector<128x128xf32>
    %15 = math.tanh %14 : vector<128x128xf32>
    %16 = arith.truncf %15 : vector<128x128xf32> to vector<128x128xbf16>
    %c0_7 = arith.constant 0 : index
    %c0_8 = arith.constant 0 : index
    %17 = vector.load %arg5[%c0_7, %c0_8] : memref<128x256xbf16, #tpu.memory_space<vmem>>, vector<128x256xbf16>
    %cst_9 = arith.constant dense<0.000000e+00> : vector<128x256xf32>
    %18 = tpu.matmul %16, %17, %cst_9 {dimension_numbers = #tpu.dot_dimension_numbers<[1], [0], [0], [1], [0, 0, 1, 1], [], []>} : vector<128x128xbf16>, vector<128x256xbf16>, vector<128x256xf32> -> vector<128x256xf32>
    %c0_10 = arith.constant 0 : index
    %c0_11 = arith.constant 0 : index
    %19 = vector.load %arg6[%c0_10, %c0_11] : memref<1x256xf32, #tpu.memory_space<vmem>>, vector<1x256xf32>
    %20 = vector.broadcast %19 : vector<1x256xf32> to vector<128x256xf32>
    %21 = arith.addf %18, %20 : vector<128x256xf32>
    %c0_12 = arith.constant 0 : index
    %c0_13 = arith.constant 0 : index
    %22 = vector.load %arg12[%c0_12, %c0_13] : memref<128x256xf32, #tpu.memory_space<vmem>>, vector<128x256xf32>
    tpu.vector_store %arg12[%c0_12, %c0_13], %21 {strides = array<i32>} : memref<128x256xf32, #tpu.memory_space<vmem>>, vector<128x256xf32>,
    %23 = vector.extract_strided_slice %21 {offsets = [0, 0], sizes = [128, 128], strides = [1, 1]} : vector<128x256xf32> to vector<128x128xf32>
    %24 = arith.truncf %23 : vector<128x128xf32> to vector<128x128xbf16>
    %c0_14 = arith.constant 0 : index
    %c0_15 = arith.constant 0 : index
    %25 = vector.load %arg7[%c0_14, %c0_15] : memref<128x128xbf16, #tpu.memory_space<vmem>>, vector<128x128xbf16>
    %cst_16 = arith.constant dense<0.000000e+00> : vector<128x128xf32>
    %26 = tpu.matmul %24, %25, %cst_16 {dimension_numbers = #tpu.dot_dimension_numbers<[1], [0], [0], [1], [0, 0, 1, 1], [], []>} : vector<128x128xbf16>, vector<128x128xbf16>, vector<128x128xf32> -> vector<128x128xf32>
    %c0_17 = arith.constant 0 : index
    %c0_18 = arith.constant 0 : index
    %27 = vector.load %arg8[%c0_17, %c0_18] : memref<1x128xf32, #tpu.memory_space<vmem>>, vector<1x128xf32>
    %28 = vector.broadcast %27 : vector<1x128xf32> to vector<128x128xf32>
    %29 = arith.addf %26, %28 : vector<128x128xf32>
    %30 = math.tanh %29 : vector<128x128xf32>
    %31 = arith.truncf %30 : vector<128x128xf32> to vector<128x128xbf16>
    %c0_19 = arith.constant 0 : index
    %c0_20 = arith.constant 0 : index
    %32 = vector.load %arg9[%c0_19, %c0_20] : memref<128x512xbf16, #tpu.memory_space<vmem>>, vector<128x512xbf16>
    %cst_21 = arith.constant dense<0.000000e+00> : vector<128x512xf32>
    %33 = tpu.matmul %31, %32, %cst_21 {dimension_numbers = #tpu.dot_dimension_numbers<[1], [0], [0], [1], [0, 0, 1, 1], [], []>} : vector<128x128xbf16>, vector<128x512xbf16>, vector<128x512xf32> -> vector<128x512xf32>
    %c0_22 = arith.constant 0 : index
    %c0_23 = arith.constant 0 : index
    %34 = vector.load %arg10[%c0_22, %c0_23] : memref<1x512xf32, #tpu.memory_space<vmem>>, vector<1x512xf32>
    %35 = vector.broadcast %34 : vector<1x512xf32> to vector<128x512xf32>
    %36 = arith.addf %33, %35 : vector<128x512xf32>
    %c0_24 = arith.constant 0 : index
    %c0_25 = arith.constant 0 : index
    %37 = vector.load %arg2[%c0_24, %c0_25] : memref<128x1xf32, #tpu.memory_space<vmem>>, vector<128x1xf32>
    %38 = vector.broadcast %37 : vector<128x1xf32> to vector<128x512xf32>
    %39 = arith.addf %36, %38 : vector<128x512xf32>
    %c0_26 = arith.constant 0 : index
    %c0_27 = arith.constant 0 : index
    %40 = vector.load %arg11[%c0_26, %c0_27] : memref<128x512xf32, #tpu.memory_space<vmem>>, vector<128x512xf32>
    tpu.vector_store %arg11[%c0_26, %c0_27], %39 {strides = array<i32>} : memref<128x512xf32, #tpu.memory_space<vmem>>, vector<128x512xf32>,
    return
  }
  func.func @transform_0(%arg0: i32) -> (i32, i32) {
    %c0_i32 = arith.constant 0 : i32
    %c0_i32_0 = arith.constant 0 : i32
    return %arg0, %c0_i32 : i32, i32
  }
  func.func @transform_1(%arg0: i32) -> (i32, i32) {
    %c0_i32 = arith.constant 0 : i32
    %c0_i32_0 = arith.constant 0 : i32
    return %arg0, %c0_i32 : i32, i32
  }
  func.func @transform_2(%arg0: i32) -> (i32, i32) {
    %c0_i32 = arith.constant 0 : i32
    %c0_i32_0 = arith.constant 0 : i32
    %c0_i32_1 = arith.constant 0 : i32
    return %c0_i32, %c0_i32_0 : i32, i32
  }
  func.func @transform_3(%arg0: i32) -> (i32, i32) {
    %c0_i32 = arith.constant 0 : i32
    %c0_i32_0 = arith.constant 0 : i32
    %c0_i32_1 = arith.constant 0 : i32
    return %c0_i32, %c0_i32_0 : i32, i32
  }
  func.func @transform_4(%arg0: i32) -> (i32, i32) {
    %c0_i32 = arith.constant 0 : i32
    %c0_i32_0 = arith.constant 0 : i32
    %c0_i32_1 = arith.constant 0 : i32
    return %c0_i32, %c0_i32_0 : i32, i32
  }
  func.func @transform_5(%arg0: i32) -> (i32, i32) {
    %c0_i32 = arith.constant 0 : i32
    %c0_i32_0 = arith.constant 0 : i32
    %c0_i32_1 = arith.constant 0 : i32
    return %c0_i32, %c0_i32_0 : i32, i32
  }
  func.func @transform_6(%arg0: i32) -> (i32, i32) {
    %c0_i32 = arith.constant 0 : i32
    %c0_i32_0 = arith.constant 0 : i32
    %c0_i32_1 = arith.constant 0 : i32
    return %c0_i32, %c0_i32_0 : i32, i32
  }
  func.func @transform_7(%arg0: i32) -> (i32, i32) {
    %c0_i32 = arith.constant 0 : i32
    %c0_i32_0 = arith.constant 0 : i32
    %c0_i32_1 = arith.constant 0 : i32
    return %c0_i32, %c0_i32_0 : i32, i32
  }
  func.func @transform_8(%arg0: i32) -> (i32, i32) {
    %c0_i32 = arith.constant 0 : i32
    %c0_i32_0 = arith.constant 0 : i32
    %c0_i32_1 = arith.constant 0 : i32
    return %c0_i32, %c0_i32_0 : i32, i32
  }
  func.func @transform_9(%arg0: i32) -> (i32, i32) {
    %c0_i32 = arith.constant 0 : i32
    %c0_i32_0 = arith.constant 0 : i32
    %c0_i32_1 = arith.constant 0 : i32
    return %c0_i32, %c0_i32_0 : i32, i32
  }
  func.func @transform_10(%arg0: i32) -> (i32, i32) {
    %c0_i32 = arith.constant 0 : i32
    %c0_i32_0 = arith.constant 0 : i32
    return %arg0, %c0_i32 : i32, i32
  }
  func.func @transform_11(%arg0: i32) -> (i32, i32) {
    %c0_i32 = arith.constant 0 : i32
    %c0_i32_0 = arith.constant 0 : i32
    return %arg0, %c0_i32 : i32, i32
  }
}

</mosaic_0001>

<bundles_post_ra>
// kernel: tpu_custom_call.1
= control target key start
LH: loop header
LB: loop body
LE: loop exit
PB: predicated region body
PF: predicated region fallthrough
CT: control target
= control target key end

     0   :  { %s5202_s0 = inlined_call_operand.hbm [shape: f32[256,512], index: 0, kind: input, shape index: {}]   ;;  %s5203_s1 = inlined_call_operand.vmem [shape: f32[256,1], index: 1, kind: input, shape index: {}]   ;;  %s5204_s2 = inlined_call_operand.vmem [shape: bf16[512,128], index: 2, kind: input, shape index: {}]   ;;  %s5205_s3 = inlined_call_operand.hbm [shape: f32[1,128], index: 3, kind: input, shape index: {}]   ;;  %s5206_s4 = inlined_call_operand.hbm [shape: bf16[128,256], index: 4, kind: input, shape index: {}]   ;;  %s5207_s5 = inlined_call_operand.hbm [shape: f32[1,256], index: 5, kind: input, shape index: {}]   ;;  %s5208_s6 = inlined_call_operand.hbm [shape: bf16[128,128], index: 6, kind: input, shape index: {}]   ;;  %s5209_s7 = inlined_call_operand.vmem [shape: f32[1,128], index: 7, kind: input, shape index: {}]   ;;  %s5210_s8 = inlined_call_operand.hbm [shape: bf16[128,512], index: 8, kind: input, shape index: {}]   ;;  %s5211_s9 = inlined_call_operand.vmem [shape: f32[1,512], index: 9, kind: input, shape index: {}]   ;;  %s5212_s10 = inlined_call_operand.hbm [shape: f32[256,512], index: 10, kind: output, shape index: {0}]   ;;  %s5213_s11 = inlined_call_operand.hbm [shape: f32[256,256], index: 11, kind: output, shape index: {1}]  }
   0x1   :  { %5255 = sst [smem:[#allocation64_spill]] %s5205_s3 }
   0x2   :  { %5256 = sst [smem:[#allocation65_spill]] %s5206_s4 }
   0x3   :  { %5257 = sst [smem:[#allocation66_spill]] %s5207_s5 }
   0x4   :  { %5258 = sst [smem:[#allocation67_spill]] %s5208_s6 }
   0x5   :  { %5259 = sst [smem:[#allocation68_spill]] %s5210_s8 }
   0x6   :  { %17 = vsyncpa [#allocation3], 0 }
   0x7   :  { %19 = vsyncpa [#allocation3 + $0x1], 0 }
   0x8   :  { %20 = vsyncpa [#allocation6], 0 }
   0x9   :  { %21 = vsyncpa [#allocation9], 0 }
   0xa   :  { %22 = vsyncpa [#allocation12], 0 }
   0xb   :  { %23 = vsyncpa [#allocation4], 0 }
   0xc   :  { %25 = vsyncpa [#allocation4 + $0x1], 0 }
   0xd   :  { %26 = vsyncpa [#allocation15], 0 }
   0xe   :  { %28 = vsyncpa [#allocation15 + $0x1], 0  ;;  %s3781_s17 = smov 0   ;;  %s3783_s18 = smov 0  }
   0xf   :  { %s3785_s19 = smov 0   ;;  %s3787_s20 = smov 0  }
  0x10 LB: > { %s5260_s3 = sld [smem:[#allocation64_spill]]  ;;  %s3805_s24 = sadd.s32 4294967295, %s3701_s20   ;;  %s3701_s20 = sphi %s3787_s20, %s5372_s20   ;;  %s3697_s19 = sphi %s3785_s19, %s5371_s19   ;;  %s3693_s18 = sphi %s3783_s18, %s5370_s18   ;;  %s3689_s17 = sphi %s3781_s17, %s5369_s17  }
  0x11   : > { %p2693_p0 = scmp.ge.s32.totalorder %s3701_s20, 1  ;;  %p55_p1 = scmp.eq.s32.totalorder %s3805_s24, 0 }
  0x12   : > { %p311_p2 = scmp.lt.s32.totalorder %s3701_s20, 3  ;;  %s3703_s26 = smov [#allocation5]  }
  0x13   : > { %s328_s27 = sshll.u32 %s3703_s26, 4  ;;  %s5262_s5 = sld [smem:[#allocation66_spill]]  ;;  %s329_s27 = int_to_ptr.vmem [resolvable:$true] %s328_s27 }
  0x14   : > { %p3810_p3 = pnand %p2693_p0, %p311_p2  ;;  %s3704_s13 = smov [#allocation8]  }
  0x15   : > { %s354_s14 = sshll.u32 %s3704_s13, 4  ;;  %s5264_s4 = sld [smem:[#allocation65_spill]]  ;;  %s355_s14 = int_to_ptr.vmem [resolvable:$true] %s354_s14 }
  0x16   : > { %s326_s23 = sshll.u32 %s5260_s3, 4  ;;  %p3221_p5 = pneg %p3810_p3  ;;  %s327_s23 = int_to_ptr.hbm [resolvable:$true] %s326_s23 }
  0x17   : > { %s3705_s22 = smov [#allocation7]   ;;  %s5265_s6 = sld [smem:[#allocation67_spill]] }
  0x18   : > { %p3822_p6 = pnand %p3221_p5, %p55_p1  ;;  %s339_s26 = sshll.u32 %s3705_s22, 4  ;;  %s340_s26 = int_to_ptr.vmem [resolvable:$true] %s339_s26 }
  0x19   : > { %s352_s30 = sshll.u32 %s5262_s5, 4  ;;  %s3706_s5 = smov 128   ;;  %s353_s30 = int_to_ptr.hbm [resolvable:$true] %s352_s30 }
  0x1a   : > { %3224 = dma.hbm_to_vmem [thread:$0]  (!%p3822_p6), %s327_s23, 16, %s329_s27, [#allocation6]  }
  0x1b   : > { %s337_s21 = sshll.u32 %s5264_s4, 4  ;;  %s3707_s13 = smov 8   ;;  %s338_s21 = int_to_ptr.hbm [resolvable:$true] %s337_s21 }
  0x1c   : > { %3230 = dma.hbm_to_vmem [thread:$0]  (!%p3822_p6), %s353_s30, 32, %s355_s14, [#allocation9]  }
  0x1d   : > { %s363_s3 = sshll.u32 %s5265_s6, 4  ;;  %s3708_s15 = smov [#allocation10]   ;;  %s364_s3 = int_to_ptr.hbm [resolvable:$true] %s363_s3 }
  0x1e   : > { %3227 = dma.hbm_to_vmem [thread:$0]  (!%p3822_p6), %s338_s21, 2048, %s340_s26, [#allocation6], %s3706_s5, %s3706_s5, %s3707_s13  }
  0x1f   : > { %s365_s23 = sshll.u32 %s3708_s15, 4  ;;  %s3709_s27 = smov 64   ;;  %s366_s23 = int_to_ptr.vmem [resolvable:$true] %s365_s23 }
  0x20   : > { %s3710_s30 = smov 4   ;;  %s5266_s8 = sld [smem:[#allocation68_spill]] }
  0x21   : > { %3233 = dma.hbm_to_vmem [thread:$0]  (!%p3822_p6), %s364_s3, 1024, %s366_s23, [#allocation9], %s3709_s27, %s3709_s27, %s3710_s30  }
  0x22   : > { %s3711_s21 = smov [#allocation11]   ;;  %s3712_s26 = smov 256  }
  0x23   : > { %s382_s22 = sshll.u32 %s3711_s21, 4  ;;  %s3713_s28 = smov 16   ;;  %s383_s22 = int_to_ptr.vmem [resolvable:$true] %s382_s22 }
  0x24   : > { %s2692_s3 = sadd.s32 4294967294, %s3701_s20   ;;  %s3847_s29 = sadd.s32 1, %s3701_s20  }
  0x25   : > { %s41_s13 = sadd.s32 1, %s3697_s19  ;;  %s38_s15 = ssub.s32 %s3701_s20, %s3847_s29 }
  0x26   : > { %s380_s5 = sshll.u32 %s5266_s8, 4  ;;  %p48_p7 = scmp.ne.s32.totalorder %s3697_s19, %s3693_s18  ;;  %s381_s5 = int_to_ptr.hbm [resolvable:$true] %s380_s5 }
  0x27   : > { %3236 = dma.hbm_to_vmem [thread:$0]  (!%p3822_p6), %s381_s5, 4096, %s383_s22, [#allocation12], %s3712_s26, %s3712_s26, %s3713_s28  }
  0x28   : > { %p39_p8 = scmp.eq.s32.totalorder %s38_s15, 0  ;;  %p49_p9 = scmp.eq.s32.totalorder %s3701_s20, 0 }
  0x29   : > { %p54_p10 = scmp.ne.s32.totalorder %s3693_s18, %s3689_s17  ;;  %p272_p11 = scmp.eq.s32.totalorder %s3805_s24, 1 }
  0x2a   : > { %s3859_s23 = scalar_select %p39_p8, %s3697_s19, %s41_s13  }
  0x2b   : > { %p3861_p12 = por %p49_p9, %p48_p7  ;;  %p3867_p13 = por %p55_p1, %p54_p10 }
  0x2c   : > { %5267 = sst [smem:[#allocation22_spill]] %s3859_s23  ;;  %p3871_p0 = por %p272_p11, %p48_p7 }
  0x2d   : > { %p278_p2 = scmp.eq.s32.totalorder %s2692_s3, 1  ;;  %p3253_p5 = scmp.lt.s32.totalorder %s3701_s20, 2 }
  0x2e   : > { %s399_s14 = sand.u32 1, %s3697_s19   ;;  %s3078_s21 = sshll.u32 %s3701_s20, 9 }
  0x2f   : > { %p3877_p6 = por %p278_p2, %p54_p10  ;;  %s2700_s5 = sshll.u32 %s399_s14, 9 }
  0x30   : > { %s409_s28 = scalar_lea.hbm %s5202_s0, %s3078_s21  ;;  %s403_s15 = scalar_lea.vmem [#allocation2], %s2700_s5 }
  0x31   : > { %s410_s13 = sshll.u32 %s409_s28, 4  ;;  %s412_s4 = sshll.u32 %s403_s15, 4  ;;  %s411_s13 = int_to_ptr.hbm [resolvable:$true] %s410_s13  ;;  %s413_s4 = int_to_ptr.vmem [resolvable:$true] %s412_s4 }
  0x32   : > { %p3887_p7 = pnand %p3253_p5, %p3861_p12  ;;  %s400_s6 = scalar_lea.sflag [#allocation3], %s399_s14 }
  0x33   : > { %s3561_s8 = sshra.s32 %s411_s13, 4  ;;  %s3568_s22 = scalar_lea.hbm %s5202_s0, 1024  ;;  %s3562_s8 = int_to_ptr.hbm [resolvable:$true] %s3561_s8 }
  0x34   : > { %s3563_s23 = scalar_lea.hbm %s3562_s8, 512  ;;  %p3565_p9 = pneg %p3887_p7 }
  0x35   : > { %p3564_p8 = scmp.ne.s32.totalorder %s3562_s8, %s3563_s23  ;;  %p3569_p12 = scmp.lt.s32.totalorder %s3562_s8, %s5202_s0 }
  0x36   : > { %p3570_p2 = scmp.lt.s32.totalorder %s3568_s22, %s3563_s23 }
  0x37   : > { %p3566_p10 = pnand %p3565_p9, %p3564_p8 }
  0x38   : > { %p3571_p5 = por %p3570_p2, %p3569_p12 }
  0x39   : > { %p3567_p11 = pneg %p3566_p10 }
  0x3b   : > { %p3572_p4 = pnand %p3571_p5, %p3567_p11 }
  0x3d   : > { %3575 = shalt.err (!%p3572_p4)
}
  0x3e   : > { %s3714_s14 = smov 512   ;;  %s3715_s28 = smov 32  }
  0x3f   : > { %3240 = dma.hbm_to_vmem [thread:$0]  (!%p3887_p7), %s411_s13, 8192, %s413_s4, %s400_s6, %s3714_s14, %s3714_s14, %s3715_s28  }
  0x40   : > { %433 = sbr.rel (%p3810_p3) target bundleno = 1035 (0x40b), region = 60 }
  0x45   : > { %s3904_s15 = sand.u32 1, %s3693_s18  }
  0x46   : > { %s2705_s8 = sshll.u32 %s3904_s15, 9  ;;  %s436_s23 = scalar_lea.sflag [#allocation3], %s3904_s15 }
  0x47   : > { %s3910_s21 = scalar_lea.vmem [#allocation2], %s2705_s8 }
  0x48   : > { %3664 = dma.done.wait (%p3867_p13), %s436_s23, 8192  }
  0x49   : > { %3666 = vsyncadd (%p3867_p13), %s436_s23, 4294959104 }
  0x4a   : > { %3668 = dma.done.wait (%p55_p1), [#allocation6], 2064  }
  0x4b   : > { %3670 = vsyncadd (%p55_p1), [#allocation6], 4294965232 }
  0x4c   : > { %3672 = dma.done.wait (%p55_p1), [#allocation9], 1056  }
  0x4d   : > { %3674 = vsyncadd (%p55_p1), [#allocation9], 4294966240 }
  0x4e   : > { %3676 = dma.done.wait (%p55_p1), [#allocation12], 4096  }
  0x4f   : > { %3678 = vsyncadd (%p55_p1), [#allocation12], 4294963200  ;;  %v3929_v0 = vld [vmem:[%s3910_s21 + $0xc0] sm:$0xff]  ;;  %v3932_v1 = vld [vmem:[%s3910_s21 + $0xc8] sm:$0xff]  ;;  %s2712_s26 = sshll.u32 %s3904_s15, 8  ;;  %s2713_s14 = sshll.u32 %s3805_s24, 4 }
  0x50   : > { %v3935_v2 = vld [vmem:[%s3910_s21 + $0xd0] sm:$0xff]  ;;  %v3938_v3 = vld [vmem:[%s3910_s21 + $0xd8] sm:$0xff]  ;;  %v611_v4 = vmul.f32 %v3929_v0, %v3929_v0  ;;  %v612_v5 = vmul.f32 %v3932_v1, %v3932_v1  ;;  %v3947_v7 = vld [vmem:[%s3910_s21 + $0x80] sm:$0xff]  ;;  %s4899_s27 = scalar_lea.vmem [#allocation14], %s2712_s26  ;;  %p516_p1 = scmp.lt.s32.totalorder %s2713_s14, 31 }
  0x51   : > { %5273 = vst [vmem:[#allocation23_spill] sm:$0xff] %v3938_v3  ;;  %v613_v6 = vmul.f32 %v3935_v2, %v3935_v2  ;;  %v3950_v8 = vld [vmem:[%s3910_s21 + $0x88] sm:$0xff]  ;;  %v614_v9 = vmul.f32 %v3938_v3, %v3938_v3  ;;  %v3955_v10 = vld [vmem:[%s3910_s21 + $0x90] sm:$0xff]  ;;  %v3958_v11 = vld [vmem:[%s3910_s21 + $0x98] sm:$0xff]  ;;  %v603_v12 = vmul.f32 %v3947_v7, %v3947_v7  ;;  %s5021_s3 = scalar_lea.vmem [#allocation13], %s2705_s8  ;;  %s3170_s8 = sshll.u32 %s3805_s24, 8 }
  0x52   : > { %5274 = vst [vmem:[#allocation24_spill] sm:$0xff] %v3958_v11  ;;  %v604_v13 = vmul.f32 %v3950_v8, %v3950_v8  ;;  %v3965_v14 = vld [vmem:[%s3910_s21 + $0x100] sm:$0xff]  ;;  %v681_v15 = vadd.f32 %v612_v5, %v611_v4  ;;  %v605_v16 = vmul.f32 %v3955_v10, %v3955_v10  ;;  %v606_v17 = vmul.f32 %v3958_v11, %v3958_v11  ;;  %v3972_v18 = vld [vmem:[%s3910_s21 + $0x108] sm:$0xff]  ;;  %v3975_v19 = vld [vmem:[%s3910_s21 + $0x110] sm:$0xff]  ;;  %s5374_s14 = smov (!%p516_p1, %s2713_s14), 31  ;;  %s2523_s5 = sshll.u32 %s4899_s27, 4  ;;  %s5034_s5 = int_to_ptr.vmem [resolvable:$true] %s2523_s5 }
  0x53   : > { %v3978_v20 = vld [vmem:[%s3910_s21 + $0x118] sm:$0xff]  ;;  %v619_v21 = vmul.f32 %v3965_v14, %v3965_v14  ;;  %v620_v23 = vmul.f32 %v3972_v18, %v3972_v18  ;;  %v621_v24 = vmul.f32 %v3975_v19, %v3975_v19  ;;  %v3989_v26 = vld [vmem:[%s3910_s21 + $0xe0] sm:$0xff]  ;;  %v3992_v27 = vld [vmem:[%s3910_s21 + $0xe8] sm:$0xff]  ;;  %s2714_s28 = sshll.u32 %s5374_s14, 3  ;;  %s2522_s14 = scalar_lea.hbm %s5213_s11, %s3170_s8 }
  0x54   : > { %5275 = vst [vmem:[#allocation25_spill] sm:$0xff] %v3978_v20  ;;  %v671_v22 = vadd.f32 %v604_v13, %v603_v12  ;;  %v622_v25 = vmul.f32 %v3978_v20, %v3978_v20  ;;  %v3995_v28 = vld [vmem:[%s3910_s21 + $0xf0] sm:$0xff]  ;;  %v682_v29 = vadd.f32 %v681_v15, %v613_v6  ;;  %v3998_v30 = vld [vmem:[%s3910_s21 + $0xf8] sm:$0xff]  ;;  %v615_v31 = vmul.f32 %v3989_v26, %v3989_v26  ;;  %v4007_v34 = vld [vmem:[%s3910_s21 + $0xa0] sm:$0xff]  ;;  %s4967_s4 = scalar_lea.vmem %s5203_s1, %s2714_s28  ;;  %s2525_s28 = sshll.u32 %s2522_s14, 4  ;;  %s2526_s28 = int_to_ptr.hbm [resolvable:$true] %s2525_s28 }
  0x55   : > { %5276 = vst [vmem:[#allocation26_spill] sm:$0xff] %v3998_v30  ;;  %v616_v32 = vmul.f32 %v3992_v27, %v3992_v27  ;;  %v617_v33 = vmul.f32 %v3995_v28, %v3995_v28  ;;  %v4010_v35 = vld [vmem:[%s3910_s21 + $0xa8] sm:$0xff]  ;;  %v691_v37 = vadd.f32 %v620_v23, %v619_v21  ;;  %v618_v38 = vmul.f32 %v3998_v30, %v3998_v30  ;;  %v4015_v39 = vld [vmem:[%s3910_s21 + $0xb0] sm:$0xff]  ;;  %v4018_v40 = vld [vmem:[%s3910_s21 + $0xb8] sm:$0xff]  ;;  %s3605_s23 = sshra.s32 %s2526_s28, 4  ;;  %s3611_s25 = scalar_lea.hbm %s5213_s11, 512  ;;  %s3606_s23 = int_to_ptr.hbm [resolvable:$true] %s3605_s23 }
  0x56   : > { %v672_v36 = vadd.f32 %v671_v22, %v605_v16  ;;  %5277 = vst [vmem:[#allocation27_spill] sm:$0xff] %v4018_v40  ;;  %v607_v41 = vmul.f32 %v4007_v34, %v4007_v34  ;;  %v4023_v42 = vld [vmem:[%s3910_s21 + $0x120] sm:$0xff]  ;;  %v683_v43 = vadd.f32 %v682_v29, %v614_v9  ;;  %v608_v45 = vmul.f32 %v4010_v35, %v4010_v35  ;;  %v4030_v47 = vld [vmem:[%s3910_s21 + $0x128] sm:$0xff]  ;;  %v4033_v48 = vld [vmem:[%s3910_s21 + $0x130] sm:$0xff]  ;;  %p3612_p7 = scmp.lt.s32.totalorder %s3606_s23, %s5213_s11 }
  0x57   : > { %v686_v44 = vadd.f32 %v616_v32, %v615_v31  ;;  %v609_v46 = vmul.f32 %v4015_v39, %v4015_v39  ;;  %v692_v50 = vadd.f32 %v691_v37, %v621_v24  ;;  %v610_v51 = vmul.f32 %v4018_v40, %v4018_v40  ;;  %v4040_v53 = vld [vmem:[%s3910_s21 + $0x20] sm:$0xff]  ;;  %v4043_v54 = vld [vmem:[%s3910_s21 + $0x28] sm:$0xff]  ;;  %v4046_v57 = vld [vmem:[%s3910_s21 + $0x138] sm:$0xff] }
  0x58   : > { %v673_v49 = vadd.f32 %v672_v36, %v606_v17  ;;  %v623_v52 = vmul.f32 %v4023_v42, %v4023_v42  ;;  %5278 = vst [vmem:[#allocation28_spill] sm:$0xff] %v4043_v54  ;;  %684 = vadd.xlane.f32.xlu1 %v683_v43  ;;  %v676_v56 = vadd.f32 %v608_v45, %v607_v41  ;;  %v4053_v60 = vld [vmem:[%s3910_s21] sm:$0xff]  ;;  %v4056_v61 = vld [vmem:[%s3910_s21 + $0x8] sm:$0xff]  ;;  %v4059_v63 = vld [vmem:[%s3910_s21 + $0x30] sm:$0xff] }
  0x59   : > { %v687_v55 = vadd.f32 %v686_v44, %v617_v33  ;;  %5279 = vst [vmem:[#allocation29_spill] sm:$0xff] %v4046_v57  ;;  %v624_v58 = vmul.f32 %v4030_v47, %v4030_v47  ;;  %v625_v59 = vmul.f32 %v4033_v48, %v4033_v48  ;;  %v693_v62 = vadd.f32 %v692_v50, %v622_v25  ;;  %v4066_v12 = vld [vmem:[%s3910_s21 + $0x10] sm:$0xff]  ;;  %v4069_v13 = vld [vmem:[%s3910_s21 + $0x140] sm:$0xff]  ;;  %v4072_v15 = vld [vmem:[%s3910_s21 + $0x148] sm:$0xff] }
  0x5a   : > { %5280 = vst [vmem:[#allocation30_spill] sm:$0xff] %v4056_v61  ;;  %674 = vadd.xlane.f32.xlu0 %v673_v49  ;;  %v591_v4 = vmul.f32 %v4040_v53, %v4040_v53  ;;  %v592_v5 = vmul.f32 %v4043_v54, %v4043_v54  ;;  %v677_v6 = vadd.f32 %v676_v56, %v609_v46  ;;  %v4083_v31 = vld [vmem:[%s3910_s21 + $0x150] sm:$0xff]  ;;  %v4086_v32 = vld [vmem:[%s3910_s21 + $0x38] sm:$0xff]  ;;  %v4095_v41 = vld [vmem:[%s3910_s21 + $0x40] sm:$0xff] }
  0x5b   : > { %v696_v9 = vadd.f32 %v624_v58, %v623_v52  ;;  %5281 = vst [vmem:[#allocation31_spill] sm:$0xff] %v4069_v13  ;;  %694 = vadd.xlane.f32.xlu2 %v693_v62  ;;  %v688_v16 = vadd.f32 %v687_v55, %v618_v38  ;;  %v626_v17 = vmul.f32 %v4046_v57, %v4046_v57  ;;  %v4098_v43 = vld [vmem:[%s3910_s21 + $0x48] sm:$0xff]  ;;  %v4101_v44 = vld [vmem:[%s3910_s21 + $0x18] sm:$0xff]  ;;  %v4106_v50 = vld [vmem:[%s3910_s21 + $0x160] sm:$0xff] }
  0x5c   : > { %5282 = vst [vmem:[#allocation32_spill] sm:$0xff] %v4072_v15  ;;  %v587_v21 = vmul.f32 %v4053_v60, %v4053_v60  ;;  %v588_v22 = vmul.f32 %v4056_v61, %v4056_v61  ;;  %v678_v23 = vadd.f32 %v677_v6, %v610_v51  ;;  %v593_v25 = vmul.f32 %v4059_v63, %v4059_v63  ;;  %v4109_v51 = vld [vmem:[%s3910_s21 + $0x168] sm:$0xff]  ;;  %v4114_v56 = vld [vmem:[%s3910_s21 + $0x158] sm:$0xff]  ;;  %v4117_v58 = vld [vmem:[%s3910_s21 + $0x60] sm:$0xff] }
  0x5d   : > { %v697_v24 = vadd.f32 %v696_v9, %v625_v59  ;;  %v656_v29 = vadd.f32 %v592_v5, %v591_v4  ;;  %5283 = vst [vmem:[#allocation33_spill] sm:$0xff] %v4083_v31  ;;  %v589_v33 = vmul.f32 %v4066_v12, %v4066_v12  ;;  %v627_v37 = vmul.f32 %v4069_v13, %v4069_v13  ;;  %v4120_v59 = vld [vmem:[%s3910_s21 + $0x68] sm:$0xff]  ;;  %v4129_v9 = vld [vmem:[%s3910_s21 + $0x50] sm:$0xff]  ;;  %v4218_v54 = vld [vmem:[%s3910_s21 + $0x1e0] sm:$0xff] }
  0x5e   : > { %5284 = vst [vmem:[#allocation34_spill] sm:$0xff] %v4086_v32  ;;  %v651_v36 = vadd.f32 %v588_v22, %v587_v21  ;;  %v628_v38 = vmul.f32 %v4072_v15, %v4072_v15  ;;  %v629_v46 = vmul.f32 %v4083_v31, %v4083_v31  ;;  %v594_v52 = vmul.f32 %v4086_v32, %v4086_v32  ;;  %v4167_v31 = vld [vmem:[%s3910_s21 + $0x188] sm:$0xff]  ;;  %v4181_v15 = vld [vmem:[%s3910_s21 + $0x1c0] sm:$0xff] }
  0x5f   : > { %5285 = vst [vmem:[#allocation35_spill] sm:$0xff] %v4098_v43  ;;  %v698_v45 = vadd.f32 %v697_v24, %v626_v17  ;;  %v657_v55 = vadd.f32 %v656_v29, %v593_v25  ;;  %v595_v62 = vmul.f32 %v4095_v41, %v4095_v41  ;;  %v596_v4 = vmul.f32 %v4098_v43, %v4098_v43  ;;  %v4155_v43 = vld [vmem:[%s3910_s21 + $0x1a0] sm:$0xff] }
  0x60   : > { %v701_v49 = vadd.f32 %v628_v38, %v627_v37  ;;  %5286 = vst [vmem:[#allocation36_spill] sm:$0xff] %v4106_v50  ;;  %689 = vadd.xlane.f32.xlu1 %v688_v16  ;;  %v590_v5 = vmul.f32 %v4101_v44, %v4101_v44  ;;  %v652_v6 = vadd.f32 %v651_v36, %v589_v33  ;;  %v4132_v16 = vld [vmem:[%s3910_s21 + $0x170] sm:$0xff] }
  0x61   : > { %5287 = vst [vmem:[#allocation37_spill] sm:$0xff] %v4109_v51  ;;  %v631_v17 = vmul.f32 %v4106_v50, %v4106_v50  ;;  %v632_v21 = vmul.f32 %v4109_v51, %v4109_v51  ;;  %v630_v22 = vmul.f32 %v4114_v56, %v4114_v56  ;;  %v599_v24 = vmul.f32 %v4117_v58, %v4117_v58  ;;  %v4145_v33 = vld [vmem:[%s3910_s21 + $0x70] sm:$0xff] }
  0x62   : > { %5288 = vst [vmem:[#allocation38_spill] sm:$0xff] %v4114_v56  ;;  %679 = vadd.xlane.f32.xlu0 %v678_v23  ;;  %v702_v23 = vadd.f32 %v701_v49, %v629_v46  ;;  %v600_v25 = vmul.f32 %v4120_v59, %v4120_v59  ;;  %v658_v29 = vadd.f32 %v657_v55, %v594_v52  ;;  %v4161_v52 = vld [vmem:[%s3910_s21 + $0x178] sm:$0xff]  ;;  %v4164_v55 = vld [vmem:[%s3910_s21 + $0x180] sm:$0xff]  ;;  %v4207_v50 = vld [vmem:[%s3910_s21 + $0x1d0] sm:$0xff] }
  0x63   : > { %5289 = vst [vmem:[#allocation39_spill] sm:$0xff] %v4120_v59  ;;  %699 = vadd.xlane.f32.xlu2 %v698_v45  ;;  %v597_v36 = vmul.f32 %v4129_v9, %v4129_v9  ;;  %v661_v37 = vadd.f32 %v596_v4, %v595_v62  ;;  %v653_v38 = vadd.f32 %v652_v6, %v590_v5  ;;  %v4150_v45 = vld [vmem:[%s3910_s21 + $0x58] sm:$0xff]  ;;  %v4158_v59 = vld [vmem:[%s3910_s21 + $0x1a8] sm:$0xff] }
  0x64   : > { %5290 = vst [vmem:[#allocation40_spill] sm:$0xff] %v4132_v16  ;;  %v633_v46 = vmul.f32 %v4132_v16, %v4132_v16  ;;  %v706_v49 = vadd.f32 %v632_v21, %v631_v17  ;;  %v703_v62 = vadd.f32 %v702_v23, %v630_v22  ;;  %v601_v4 = vmul.f32 %v4145_v33, %v4145_v33  ;;  %v4172_v6 = vld [vmem:[%s3910_s21 + $0x78] sm:$0xff]  ;;  %v4184_v22 = vld [vmem:[%s3910_s21 + $0x1c8] sm:$0xff] }
  0x65   : > { %5291 = vst [vmem:[#allocation41_spill] sm:$0xff] %v4150_v45  ;;  %v666_v5 = vadd.f32 %v600_v25, %v599_v24  ;;  %v598_v17 = vmul.f32 %v4150_v45, %v4150_v45  ;;  %v662_v21 = vadd.f32 %v661_v37, %v597_v36  ;;  %v639_v16 = vmul.f32 %v4155_v43, %v4155_v43  ;;  %v4189_v25 = vld [vmem:[%s3910_s21 + $0x1b0] sm:$0xff] }
  0x66   : > { %5292 = vst [vmem:[#allocation42_spill] sm:$0xff] %v4155_v43  ;;  %v640_v51 = vmul.f32 %v4158_v59, %v4158_v59  ;;  %v634_v23 = vmul.f32 %v4161_v52, %v4161_v52  ;;  %v707_v24 = vadd.f32 %v706_v49, %v633_v46  ;;  %v636_v36 = vmul.f32 %v4167_v31, %v4167_v31  ;;  %v4196_v37 = vld [vmem:[%s3910_s21 + $0x190] sm:$0xff] }
  0x67   : > { %5293 = vst [vmem:[#allocation43_spill] sm:$0xff] %v4158_v59  ;;  %v667_v59 = vadd.f32 %v666_v5, %v601_v4  ;;  %v643_v46 = vmul.f32 %v4181_v15, %v4181_v15  ;;  %v644_v49 = vmul.f32 %v4184_v22, %v4184_v22  ;;  %v663_v43 = vadd.f32 %v662_v21, %v598_v17  ;;  %v4221_v17 = vld [vmem:[%s3910_s21 + $0x1e8] sm:$0xff] }
  0x68   : > { %5294 = vst [vmem:[#allocation44_spill] sm:$0xff] %v4161_v52  ;;  %659 = vadd.xlane.f32.xlu1 %v658_v29  ;;  %v635_v29 = vmul.f32 %v4164_v55, %v4164_v55  ;;  %v708_v13 = vadd.f32 %v707_v24, %v634_v23  ;;  %v637_v4 = vmul.f32 %v4196_v37, %v4196_v37 }
  0x69   : > { %5295 = vst [vmem:[#allocation45_spill] sm:$0xff] %v4164_v55  ;;  %v641_v55 = vmul.f32 %v4189_v25, %v4189_v25 }
  0x6a   : > { %5296 = vst [vmem:[#allocation46_spill] sm:$0xff] %v4167_v31  ;;  %654 = vadd.xlane.f32.xlu0 %v653_v38  ;;  %v602_v38 = vmul.f32 %v4172_v6, %v4172_v6  ;;  %v716_v31 = vadd.f32 %v640_v51, %v639_v16  ;;  %v711_v5 = vadd.f32 %v636_v36, %v635_v29 }
  0x6b   : > { %5297 = vst [vmem:[#allocation47_spill] sm:$0xff] %v4172_v6  ;;  %704 = vadd.xlane.f32.xlu2 %v703_v62  ;;  %v4210_v62 = vld [vmem:[%s3910_s21 + $0x1b8] sm:$0xff]  ;;  %v645_v51 = vmul.f32 %v4207_v50, %v4207_v50  ;;  %v721_v16 = vadd.f32 %v644_v49, %v643_v46  ;;  %v4237_v46 = vld [vmem:[%s3910_s21 + $0x1f0] sm:$0xff] }
  0x6c   : > { %5298 = vst [vmem:[#allocation48_spill] sm:$0xff] %v4181_v15  ;;  %v4215_v15 = vld [vmem:[%s3910_s21 + $0x198] sm:$0xff]  ;;  %v668_v21 = vadd.f32 %v667_v59, %v602_v38  ;;  %v642_v23 = vmul.f32 %v4210_v62, %v4210_v62  ;;  %v717_v24 = vadd.f32 %v716_v31, %v641_v55  ;;  %v712_v36 = vadd.f32 %v711_v5, %v637_v4 }
  0x6d   : > { %5299 = vst [vmem:[#allocation49_spill] sm:$0xff] %v4184_v22  ;;  %v4228_v22 = vld [vmem:[%s3910_s21 + $0x1d8] sm:$0xff]  ;;  %v638_v29 = vmul.f32 %v4215_v15, %v4215_v15  ;;  %v647_v59 = vmul.f32 %v4218_v54, %v4218_v54  ;;  %v648_v38 = vmul.f32 %v4221_v17, %v4221_v17  ;;  %v722_v31 = vadd.f32 %v721_v16, %v645_v51 }
  0x6e   : > { %5300 = vst [vmem:[#allocation50_spill] sm:$0xff] %v4189_v25  ;;  %v718_v55 = vadd.f32 %v717_v24, %v642_v23  ;;  %v4244_v4 = vld [vmem:[%s3910_s21 + $0x1f8] sm:$0xff]  ;;  %v3084_v24 = vld [vmem:[%s5204_s2 + $0x28] sm:$0xff]  ;;  %s3607_s21 = scalar_lea.hbm %s3606_s23, 256 }
  0x6f   : > { %5301 = vst [vmem:[#allocation51_spill] sm:$0xff] %v4196_v37  ;;  %v713_v49 = vadd.f32 %v712_v36, %v638_v29  ;;  %v3086_v51 = vld [vmem:[%s5204_s2 + $0x38] sm:$0xff]  ;;  %v3092_v29 = vld [vmem:[%s5204_s2 + $0x68] sm:$0xff]  ;;  %p3608_p3 = scmp.ne.s32.totalorder %s3606_s23, %s3607_s21  ;;  %p3613_p8 = scmp.lt.s32.totalorder %s3611_s25, %s3607_s21 }
  0x70   : > { %5302 = vst [vmem:[#allocation52_spill] sm:$0xff] %v4207_v50  ;;  %664 = vadd.xlane.f32.xlu1 %v663_v43  ;;  %v646_v43 = vmul.f32 %v4228_v22, %v4228_v22  ;;  %v726_v50 = vadd.f32 %v648_v38, %v647_v59  ;;  %v3094_v16 = vld [vmem:[%s5204_s2 + $0x78] sm:$0xff]  ;;  %3171 = vmatpush.bf16.msra.mxu3 %v3086_v51  ;;  %v4281_v36 = vld [vmem:[%s5204_s2 + $0xa8] sm:$0xff]  ;;  %v3083_v59 = vld [vmem:[%s5204_s2 + $0x20] sm:$0xff] }
  0x71   : > { %5303 = vst [vmem:[#allocation53_spill] sm:$0xff] %v4210_v62  ;;  %v4257_v23 = vld [vmem:[%s5204_s2 + $0xb8] sm:$0xff]  ;;  %3179 = vmatpush.bf16.msra.mxu1 %v3094_v16  ;;  %1263 = vmatpush.bf16.msra.mxu0 %v3086_v51  ;;  %v3091_v38 = vld [vmem:[%s5204_s2 + $0x60] sm:$0xff]  ;;  %v3080_v51 = vld [vmem:[%s5204_s2 + $0x8] sm:$0xff]  ;;  %p3609_p4 = pnand %p3608_p3, %p3871_p0  ;;  %p3614_p9 = por %p3613_p8, %p3612_p7 }
  0x72   : > { %5304 = vst [vmem:[#allocation54_spill] sm:$0xff] %v4215_v15  ;;  %709 = vadd.xlane.f32.xlu0 %v708_v13  ;;  %v649_v13 = vmul.f32 %v4237_v46, %v4237_v46  ;;  %v723_v5 = vadd.f32 %v722_v31, %v646_v43  ;;  %3187 = vmatpush.bf16.msra.mxu2 %v4257_v23  ;;  %v4293_v43 = vld [vmem:[%s5204_s2 + $0xa0] sm:$0xff]  ;;  %v3082_v31 = vld [vmem:[%s5204_s2 + $0x18] sm:$0xff] }
  0x73   : > { %5305 = vst [vmem:[#allocation55_spill] sm:$0xff] %v4218_v54  ;;  %669 = vadd.xlane.f32.xlu2 %v668_v21  ;;  %p3610_p13 = pneg %p3609_p4 }
  0x74   : > { %5306 = vst [vmem:[#allocation56_spill] sm:$0xff] %v4221_v17  ;;  %v650_v17 = vmul.f32 %v4244_v4, %v4244_v4  ;;  %v727_v54 = vadd.f32 %v726_v50, %v649_v13  ;;  %v3093_v50 = vld [vmem:[%s5204_s2 + $0x70] sm:$0xff] }
  0x75   : > { %5307 = vst [vmem:[#allocation57_spill] sm:$0xff] %v4228_v22  ;;  %3180 = vmatpush.bf16.msra.mxu1 %v3093_v50  ;;  %v3081_v13 = vld [vmem:[%s5204_s2 + $0x10] sm:$0xff]  ;;  %p3615_p10 = pnand %p3614_p9, %p3610_p13 }
  0x76   : > { %5308 = vst [vmem:[#allocation58_spill] sm:$0xff] %v4237_v46  ;;  %v728_v21 = vadd.f32 %v727_v54, %v650_v17  ;;  %v3085_v54 = vld [vmem:[%s5204_s2 + $0x30] sm:$0xff] }
  0x77   : > { %5309 = vst [vmem:[#allocation59_spill] sm:$0xff] %v4244_v4  ;;  %v4269_v17 = vld [vmem:[%s5204_s2 + $0xb0] sm:$0xff]  ;;  %3172 = vmatpush.bf16.msra.mxu3 %v3085_v54  ;;  %1264 = vmatpush.bf16.msra.mxu0 %v3085_v54  ;;  %v4332_v54 = vld [vmem:[%s5204_s2 + $0x48] sm:$0xff] }
  0x78   : > { %719 = vadd.xlane.f32.xlu1 %v718_v55  ;;  %3188 = vmatpush.bf16.msra.mxu2 %v4269_v17  ;;  %v4302_v55 = vld [vmem:[%s5204_s2 + $0x58] sm:$0xff] }
  0x79   : > { %3181 = vmatpush.bf16.msra.mxu1 %v3092_v29 }
  0x7a   : > { %714 = vadd.xlane.f32.xlu0 %v713_v49  ;;  %v4307_v49 = vld [vmem:[%s5204_s2 + $0x98] sm:$0xff] }
  0x7b   : > { %724 = vadd.xlane.f32.xlu2 %v723_v5  ;;  %3173 = vmatpush.bf16.msra.mxu3 %v3084_v24  ;;  %v4317_v5 = vld [vmem:[%s5204_s2 + $0x50] sm:$0xff] }
  0x7c   : > { %3189 = vmatpush.bf16.msra.mxu2 %v4281_v36  ;;  %1265 = vmatpush.bf16.msra.mxu0 %v3084_v24  ;;  %v4337_v24 = vld [vmem:[%s5204_s2 + $0x88] sm:$0xff] }
  0x7d   : > { %3182 = vmatpush.bf16.msra.mxu1 %v3091_v38  ;;  %5311 = vst [vmem:[#allocation61_spill] sm:$0xff] %v4337_v24 }
  0x7f   : > { %3174 = vmatpush.bf16.msra.mxu3 %v3083_v59 }
  0x80   : > { %3190 = vmatpush.bf16.msra.mxu2 %v4293_v43  ;;  %1266 = vmatpush.bf16.msra.mxu0 %v3083_v59  ;;  %v3079_v59 = vld [vmem:[%s5204_s2] sm:$0xff] }
  0x81   : > { %3183 = vmatpush.bf16.msra.mxu1 %v4302_v55 }
  0x82   : > { %729 = vadd.xlane.f32.xlu0 %v728_v21  ;;  %v4322_v21 = vld [vmem:[%s5204_s2 + $0x90] sm:$0xff] }
  0x83   : > { %3175 = vmatpush.bf16.msra.mxu3 %v3082_v31  ;;  %5310 = vst [vmem:[#allocation60_spill] sm:$0xff] %v4322_v21 }
  0x84   : > { %3191 = vmatpush.bf16.msra.mxu2 %v4307_v49  ;;  %1267 = vmatpush.bf16.msra.mxu0 %v3082_v31  ;;  %v4347_v31 = vld [vmem:[%s5204_s2 + $0x40] sm:$0xff] }
  0x85   : > { %3184 = vmatpush.bf16.msra.mxu1 %v4317_v5 }
  0x87   : > { %3176 = vmatpush.bf16.msra.mxu3 %v3081_v13 }
  0x88   : > { %3192 = vmatpush.bf16.msra.mxu2 %v4322_v21  ;;  %1268 = vmatpush.bf16.msra.mxu0 %v3081_v13  ;;  %v4352_v13 = vld [vmem:[%s5204_s2 + $0x80] sm:$0xff] }
  0x89   : > { %3185 = vmatpush.bf16.msra.mxu1 %v4332_v54  ;;  %5312 = vst [vmem:[#allocation62_spill] sm:$0xff] %v4352_v13 }
  0x8b   : > { %3177 = vmatpush.bf16.msra.mxu3 %v3080_v51 }
  0x8c   : > { %3193 = vmatpush.bf16.msra.mxu2 %v4337_v24  ;;  %1269 = vmatpush.bf16.msra.mxu0 %v3080_v51 }
  0x8d   : > { %3186 = vmatpush.bf16.msra.mxu1 %v4347_v31 }
  0x8f   : > { %3178 = vmatpush.bf16.msra.mxu3 %v3079_v59 }
  0x90   : > { %3194 = vmatpush.bf16.msra.mxu2 %v4352_v13  ;;  %1270 = vmatpush.bf16.msra.mxu0 %v3079_v59 }
  0x94   : > { %1312 = vmatpush.bf16.msrb.mxu0 %v3094_v16 }
  0x98   : > { %1313 = vmatpush.bf16.msrb.mxu0 %v3093_v50 }
  0x9c   : > { %1314 = vmatpush.bf16.msrb.mxu0 %v3092_v29 }
  0xa0   : > { %1315 = vmatpush.bf16.msrb.mxu0 %v3091_v38 }
  0xa4   : > { %1316 = vmatpush.bf16.msrb.mxu0 %v4302_v55 }
  0xa8   : > { %1317 = vmatpush.bf16.msrb.mxu0 %v4317_v5 }
  0xac   : > { %1318 = vmatpush.bf16.msrb.mxu0 %v4332_v54 }
  0xb0   : > { %1319 = vmatpush.bf16.msrb.mxu0 %v4347_v31 }
  0xcb   : > { %v685_v46 = vpop.xlane.xlu1 %684 }
  0xcc   : > { %v4356_v25 = vmax.f32 %v685_v46, 1e-24  ;;  %v3110_v46 = vld [vmem:[%s5204_s2 + $0xf8] sm:$0xff] }
  0xcd   : > { %v675_v4 = vpop.xlane.xlu0 %674  ;;  %1410 = vmatpush.bf16.msrb.mxu3 %v3110_v46 }
  0xce   : > { %v735_v51 = vmax.f32 %v675_v4, 1e-24  ;;  %v695_v22 = vpop.xlane.xlu2 %694  ;;  %vm813_vm14 = vweird.f32 %v4356_v25 }
  0xcf   : > { %v4365_v50 = vmax.f32 %v695_v22, 1e-24 }
  0xd0   : > { %3315 = vrsqrt.f32 %v735_v51  ;;  %vm793_vm1 = vweird.f32 %v735_v51 }
  0xd1   : > { %3317 = vrsqrt.f32 %v4356_v25 }
  0xd3   : > { %v690_v37 = vpop.xlane.xlu1 %689 }
  0xd4   : > { %v4358_v62 = vmax.f32 %v690_v37, 1e-24  ;;  %v3109_v37 = vld [vmem:[%s5204_s2 + $0xf0] sm:$0xff] }
  0xd5   : > { %v680_v15 = vpop.xlane.xlu0 %679  ;;  %1411 = vmatpush.bf16.msrb.mxu3 %v3109_v37 }
  0xd6   : > { %v3316_v61 = vpop.eup %3315  ;;  %v736_v52 = vmax.f32 %v680_v15, 1e-24  ;;  %3319 = vrsqrt.f32 %v4358_v62  ;;  %v700_v4 = vpop.xlane.xlu2 %699  ;;  %vm823_vm11 = vweird.f32 %v4358_v62 }
  0xd7   : > { %v788_v56 = vmul.f32 %v3316_v61, %v735_v51  ;;  %v4370_v15 = vpop.eup %3317  ;;  %vm794_vm0 = vweird.f32 %v3316_v61  ;;  %v4389_v3 = vmax.f32 %v700_v4, 1e-24 }
  0xd8   : > { %3321 = vrsqrt.f32 %v736_v52  ;;  %v808_v38 = vmul.f32 %v4370_v15, %v4356_v25  ;;  %vm795_vm2 = vmor %vm793_vm1, %vm794_vm0  ;;  %vm803_vm3 = vweird.f32 %v736_v52  ;;  %vm814_vm15 = vweird.f32 %v4370_v15 }
  0xd9   : > { %v789_v59 = vmul.f32 %v3316_v61, %v788_v56  ;;  %3323 = vrsqrt.f32 %v4365_v50  ;;  %vm815_vm1 = vmor %vm813_vm14, %vm814_vm15 }
  0xda   : > { %v809_v55 = vmul.f32 %v4370_v15, %v808_v38 }
  0xdb   : > { %v790_v16 = vmul.f32 0.5, %v789_v59  ;;  %v660_v13 = vpop.xlane.xlu1 %659 }
  0xdc   : > { %v4372_v24 = vpop.eup %3319  ;;  %v4374_v29 = vmax.f32 %v660_v13, 1e-24 }
  0xdd   : > { %v655_v56 = vpop.xlane.xlu0 %654  ;;  %v791_v59 = vsub.f32 1.5, %v790_v16  ;;  %v818_v13 = vmul.f32 %v4372_v24, %v4358_v62  ;;  %v3108_v16 = vld [vmem:[%s5204_s2 + $0xe8] sm:$0xff]  ;;  %vm824_vm12 = vweird.f32 %v4372_v24 }
  0xde   : > { %v3322_v57 = vpop.eup %3321  ;;  %v4376_v20 = vmax.f32 %v655_v56, 1e-24  ;;  %v705_v46 = vpop.xlane.xlu2 %704  ;;  %3325 = vrsqrt.f32 %v4374_v29  ;;  %1412 = vmatpush.bf16.msrb.mxu3 %v3108_v16  ;;  %vm763_vm6 = vweird.f32 %v4374_v29  ;;  %vm825_vm0 = vmor %vm823_vm11, %vm824_vm12 }
  0xdf   : > { %v798_v22 = vmul.f32 %v3322_v57, %v736_v52  ;;  %v792_v56 = vmul.f32 %v3316_v61, %v791_v59  ;;  %v4393_v11 = vpop.eup %3323  ;;  %vm804_vm4 = vweird.f32 %v3322_v57  ;;  %v4419_v54 = vmax.f32 %v705_v46, 1e-24 }
  0xe0   : > { %3327 = vrsqrt.f32 %v4376_v20  ;;  %v828_v38 = vmul.f32 %v4393_v11, %v4365_v50  ;;  %vm805_vm5 = vmor %vm803_vm3, %vm804_vm4  ;;  %vm753_vm8 = vweird.f32 %v4376_v20 }
  0xe1   : > { %v799_v30 = vmul.f32 %v3322_v57, %v798_v22  ;;  %v819_v22 = vmul.f32 %v4372_v24, %v818_v13  ;;  %3329 = vrsqrt.f32 %v4389_v3  ;;  %v4403_v59 = vsel %vm795_vm2, %v3316_v61, %v792_v56 }
  0xe2   : > { %5313 = vst [vmem:[#allocation63_spill] sm:$0xff] %v4403_v59  ;;  %v923_v56 = vmul.f32 %v4403_v59, %v3947_v7  ;;  %vm853_vm14 = vweird.f32 %v4419_v54 }
  0xe3   : > { %v800_v37 = vmul.f32 0.5, %v799_v30  ;;  %v665_v40 = vpop.xlane.xlu1 %664 }
  0xe4   : > { %v4396_v6 = vmax.f32 %v665_v40, 1e-24  ;;  %v4398_v45 = vpop.eup %3325  ;;  %v4408_v40 = vmul.f32 0.5, %v809_v55 }
  0xe5   : > { %v801_v21 = vsub.f32 1.5, %v800_v37  ;;  %v758_v5 = vmul.f32 %v4398_v45, %v4374_v29  ;;  %v710_v37 = vpop.xlane.xlu0 %709  ;;  %vm764_vm7 = vweird.f32 %v4398_v45 }
  0xe6   : > { %v670_v4 = vpop.xlane.xlu2 %669  ;;  %v4406_v51 = vpop.eup %3327  ;;  %3331 = vrsqrt.f32 %v4396_v6  ;;  %vm4452_vm10 = vmor %vm763_vm6, %vm764_vm7  ;;  %v811_v29 = vsub.f32 1.5, %v4408_v40  ;;  %v3107_v40 = vld [vmem:[%s5204_s2 + $0xe0] sm:$0xff]  ;;  %vm773_vm2 = vweird.f32 %v4396_v6  ;;  %vm833_vm7 = vweird.f32 %v4365_v50 }
  0xe7   : > { %v802_v30 = vmul.f32 %v3322_v57, %v801_v21  ;;  %v4412_v52 = vmax.f32 %v670_v4, 1e-24  ;;  %v820_v21 = vmul.f32 0.5, %v819_v22  ;;  %v759_v13 = vmul.f32 %v4398_v45, %v758_v5  ;;  %1413 = vmatpush.bf16.msrb.mxu3 %v3107_v40 }
  0xe8   : > { %v748_v61 = vmul.f32 %v4406_v51, %v4376_v20  ;;  %v924_v5 = vmul.f32 %v4403_v59, %v3950_v8  ;;  %v925_v4 = vmul.f32 %v4403_v59, %v3955_v10  ;;  %v4442_v10 = vmax.f32 %v710_v37, 1e-24 }
  0xe9   : > { %3333 = vrsqrt.f32 %v4412_v52  ;;  %v4422_v16 = vsel %vm805_vm5, %v3322_v57, %v802_v30  ;;  %v760_v55 = vmul.f32 0.5, %v759_v13  ;;  %v4439_v30 = vpop.eup %3329  ;;  %vm754_vm9 = vweird.f32 %v4406_v51 }
  0xea   : > { %v749_v22 = vmul.f32 %v4406_v51, %v748_v61  ;;  %v927_v57 = vmul.f32 %v4422_v16, %v4007_v34  ;;  %v928_v7 = vmul.f32 %v4422_v16, %v4010_v35  ;;  %v929_v46 = vmul.f32 %v4422_v16, %v4015_v39  ;;  %vm4471_vm13 = vmor %vm753_vm8, %vm754_vm9 }
  0xeb   : > { %v761_v13 = vsub.f32 1.5, %v760_v55  ;;  %v821_v32 = vsub.f32 1.5, %v820_v21  ;;  %v838_v21 = vmul.f32 %v4439_v30, %v4389_v3  ;;  %3335 = vrsqrt.f32 %v4419_v54 }
  0xec   : > { %v750_v8 = vmul.f32 0.5, %v749_v22  ;;  %v4444_v31 = vpop.eup %3331  ;;  %v979_v61 = vpack.c.bf16 %v927_v57, %v923_v56  ;;  %v980_v34 = vpack.c.bf16 %v928_v7, %v924_v5  ;;  %v981_v59 = vpack.c.bf16 %v929_v46, %v925_v4 }
  0xed   : > { %v762_v35 = vmul.f32 %v4398_v45, %v761_v13  ;;  %v768_v55 = vmul.f32 %v4444_v31, %v4396_v6  ;;  %3337 = vrsqrt.f32 %v4442_v10  ;;  %v829_v7 = vmul.f32 %v4393_v11, %v828_v38 }
  0xee   : > { %v751_v37 = vsub.f32 1.5, %v750_v8  ;;  %1281 = vmatmul.bf16.vlgmr.msra.gmra.mxu3 %v979_v61  ;;  %1330 = vmatmul.bf16.vlgmr.msra.gmra.mxu1 %v980_v34  ;;  %v839_v13 = vmul.f32 %v4439_v30, %v838_v21  ;;  %vm774_vm3 = vweird.f32 %v4444_v31  ;;  %vm783_vm4 = vweird.f32 %v4412_v52 }
  0xef   : > { %v4458_v22 = vpop.eup %3333  ;;  %1379 = vmatmul.bf16.vlgmr.msra.gmra.mxu2 %v981_v59  ;;  %v769_v57 = vmul.f32 %v4444_v31, %v768_v55  ;;  %v4486_v20 = vsel %vm4452_vm10, %v4398_v45, %v762_v35  ;;  %v822_v59 = vmul.f32 %v4372_v24, %v821_v32  ;;  %v812_v32 = vmul.f32 %v4370_v15, %v811_v29  ;;  %vm4529_vm6 = vmor %vm773_vm2, %vm774_vm3 }
  0xf0   : > { %v752_v56 = vmul.f32 %v4406_v51, %v751_v37  ;;  %v778_v4 = vmul.f32 %v4458_v22, %v4412_v52  ;;  %v911_v38 = vmul.f32 %v4486_v20, %v4040_v53  ;;  %v830_v55 = vmul.f32 0.5, %v829_v7 }
  0xf1   : > { %v770_v8 = vmul.f32 0.5, %v769_v57  ;;  %v4507_v35 = vpop.eup %3335  ;;  %v4514_v53 = vsel %vm825_vm0, %v4372_v24, %v822_v59  ;;  %v840_v21 = vmul.f32 0.5, %v839_v13  ;;  %vm784_vm5 = vweird.f32 %v4458_v22  ;;  %v720_v57 = vpop.xlane.xlu1 %719 }
  0xf2   : > { %v779_v46 = vmul.f32 %v4458_v22, %v778_v4  ;;  %v4500_v45 = vsel %vm4471_vm13, %v4406_v51, %v752_v56  ;;  %v4523_v25 = vsel %vm815_vm1, %v4370_v15, %v812_v32  ;;  %v935_v52 = vmul.f32 %v4514_v53, %v3989_v26  ;;  %vm4540_vm9 = vmor %vm783_vm4, %vm784_vm5  ;;  %v5324_v56 = vld [vmem:[#allocation34_spill] sm:$0xff] }
  0xf3   : > { %v907_v34 = vmul.f32 %v4500_v45, %v4053_v60  ;;  %v771_v62 = vsub.f32 1.5, %v770_v8  ;;  %v4516_v37 = vpop.eup %3337  ;;  %v848_v60 = vmul.f32 %v4507_v35, %v4419_v54  ;;  %v936_v5 = vmul.f32 %v4514_v53, %v3992_v27 }
  0xf4   : > { %v780_v61 = vmul.f32 0.5, %v779_v46  ;;  %vm834_vm8 = vweird.f32 %v4393_v11  ;;  %v858_v6 = vmul.f32 %v4516_v37, %v4442_v10  ;;  %v937_v4 = vmul.f32 %v4514_v53, %v3995_v28  ;;  %v715_v46 = vpop.xlane.xlu0 %714 }
  0xf5   : > { %v971_v51 = vpack.c.bf16 %v911_v38, %v907_v34  ;;  %v772_v24 = vmul.f32 %v4444_v31, %v771_v62  ;;  %v831_v26 = vsub.f32 1.5, %v830_v55  ;;  %v841_v40 = vsub.f32 1.5, %v840_v21  ;;  %vm4576_vm12 = vmor %vm833_vm7, %vm834_vm8  ;;  %v3106_v62 = vld [vmem:[%s5204_s2 + $0xd8] sm:$0xff] }
  0xf6   : > { %v781_v39 = vsub.f32 1.5, %v780_v61  ;;  %v931_v27 = vmul.f32 %v4523_v25, %v3929_v0  ;;  %vm843_vm10 = vweird.f32 %v4389_v3  ;;  %vm844_vm11 = vweird.f32 %v4439_v30  ;;  %1414 = vmatpush.bf16.msrb.mxu3 %v3106_v62 }
  0xf7   : > { %1271 = vmatmul.bf16.vlgmr.msra.gmra.mxu0 %v971_v51  ;;  %v849_v7 = vmul.f32 %v4507_v35, %v848_v60  ;;  %v933_v59 = vmul.f32 %v4523_v25, %v3935_v2  ;;  %v4560_v0 = vsel %vm4529_vm6, %v4444_v31, %v772_v24  ;;  %v859_v8 = vmul.f32 %v4516_v37, %v858_v6  ;;  %vm845_vm13 = vmor %vm843_vm10, %vm844_vm11 }
  0xf8   : > { %v782_v29 = vmul.f32 %v4458_v22, %v781_v39  ;;  %1361 = vmatpush.bf16.msra.mxu0 %v4257_v23  ;;  %v932_v23 = vmul.f32 %v4523_v25, %v3932_v1  ;;  %v983_v28 = vpack.c.bf16 %v935_v52, %v931_v27  ;;  %v4569_v32 = vmax.f32 %v720_v57, 1e-24  ;;  %v725_v57 = vpop.xlane.xlu2 %724 }
  0xf9   : > { %v985_v38 = vpack.c.bf16 %v937_v4, %v933_v59  ;;  %v832_v2 = vmul.f32 %v4393_v11, %v831_v26  ;;  %v850_v61 = vmul.f32 0.5, %v849_v7  ;;  %v915_v50 = vmul.f32 %v4560_v0, %v4095_v41  ;;  %v5329_v7 = vld [vmem:[#allocation60_spill] sm:$0xff] }
  0xfa   : > { %v984_v13 = vpack.c.bf16 %v936_v5, %v932_v23  ;;  %v4565_v1 = vsel %vm4540_vm9, %v4458_v22, %v782_v29  ;;  %v842_v22 = vmul.f32 %v4439_v30, %v841_v40  ;;  %v860_v39 = vmul.f32 0.5, %v859_v8  ;;  %v5325_v5 = vld [vmem:[#allocation41_spill] sm:$0xff]  ;;  %v5328_v23 = vld [vmem:[#allocation47_spill] sm:$0xff]  ;;  %v5330_v59 = vld [vmem:[#allocation24_spill] sm:$0xff] }
  0xfb   : > { %v919_v34 = vmul.f32 %v4565_v1, %v4117_v58  ;;  %3339 = vrsqrt.f32 %v4569_v32  ;;  %v836_v3 = vsel %vm4576_vm12, %v4393_v11, %v832_v2  ;;  %v851_v51 = vsub.f32 1.5, %v850_v61  ;;  %v5334_v2 = vld [vmem:[#allocation26_spill] sm:$0xff] }
  0xfc   : > { %1362 = vmatpush.bf16.msra.mxu0 %v4269_v17  ;;  %v4581_v17 = vmax.f32 %v715_v46, 1e-24  ;;  %v846_v41 = vsel %vm845_vm13, %v4439_v30, %v842_v22  ;;  %v4603_v55 = vmul.f32 %v4500_v45, %v4066_v12  ;;  %vm863_vm15 = vweird.f32 %v4442_v10  ;;  %v5331_v46 = vld [vmem:[#allocation63_spill] sm:$0xff]  ;;  %v730_v22 = vpop.xlane.xlu0 %729 }
  0xfd   : > { %v975_v58 = vpack.c.bf16 %v919_v34, %v915_v50  ;;  %v4614_v11 = vmul.f32 %v4560_v0, %v4129_v9  ;;  %v4618_v30 = vmul.f32 %v4565_v1, %v4145_v33  ;;  %vm854_vm0 = vweird.f32 %v4507_v35  ;;  %v5335_v34 = vld [vmem:[#allocation25_spill] sm:$0xff] }
  0xfe   : > { %1286 = vmatmul.bf16.gmra.mxu3 %v983_v28  ;;  %1335 = vmatmul.bf16.gmra.mxu1 %v984_v13  ;;  %3341 = vrsqrt.f32 %v4581_v17  ;;  %v861_v12 = vsub.f32 1.5, %v860_v39  ;;  %v943_v21 = vmul.f32 %v846_v41, %v4023_v42  ;;  %v940_v60 = vmul.f32 %v836_v3, %v3972_v18  ;;  %vm855_vm2 = vmor %vm853_vm14, %vm854_vm0  ;;  %v5332_v13 = vld [vmem:[#allocation27_spill] sm:$0xff] }
  0xff   : > { %1384 = vmatmul.bf16.gmra.mxu2 %v985_v38  ;;  %v944_v29 = vmul.f32 %v846_v41, %v4030_v47  ;;  %v945_v9 = vmul.f32 %v846_v41, %v4033_v48  ;;  %v852_v33 = vmul.f32 %v4507_v35, %v851_v51  ;;  %vm864_vm1 = vweird.f32 %v4516_v37  ;;  %v5333_v38 = vld [vmem:[#allocation23_spill] sm:$0xff] }
 0x100   : > { %1363 = vmatpush.bf16.msra.mxu0 %v4281_v36  ;;  %v4607_v36 = vmul.f32 %v4486_v20, %v4059_v63  ;;  %v939_v63 = vmul.f32 %v836_v3, %v3965_v14  ;;  %v3105_v14 = vld [vmem:[%s5204_s2 + $0xd0] sm:$0xff]  ;;  %v977_v42 = vpack.c.bf16 %v4618_v30, %v4614_v11  ;;  %v862_v47 = vmul.f32 %v4516_v37, %v861_v12  ;;  %vm4660_vm3 = vmor %vm863_vm15, %vm864_vm1  ;;  %v5338_v12 = vld [vmem:[#allocation38_spill] sm:$0xff] }
 0x101   : > { %v4627_v24 = vpop.eup %3339  ;;  %1415 = vmatpush.bf16.msrb.mxu3 %v3105_v14  ;;  %v4648_v48 = vmul.f32 %v4500_v45, %v4101_v44  ;;  %v4652_v52 = vmul.f32 %v4486_v20, %v5324_v56  ;;  %v4656_v15 = vmul.f32 %v4560_v0, %v5325_v5  ;;  %v988_v44 = vpack.c.bf16 %v944_v29, %v940_v60  ;;  %v5342_v5 = vld [vmem:[#allocation62_spill] sm:$0xff] }
 0x102   : > { %v973_v18 = vpack.c.bf16 %v4607_v36, %v4603_v55  ;;  %v987_v6 = vpack.c.bf16 %v943_v21, %v939_v63  ;;  %v856_v40 = vsel %vm855_vm2, %v4507_v35, %v852_v33  ;;  %v4673_v10 = vmul.f32 %v4565_v1, %v5328_v23  ;;  %v5339_v21 = vld [vmem:[#allocation44_spill] sm:$0xff] }
 0x103   : > { %v974_v27 = vpack.c.bf16 %v4652_v52, %v4648_v48  ;;  %v4678_v28 = vmul.f32 %v5331_v46, %v5330_v59  ;;  %v4682_v8 = vmul.f32 %v4422_v16, %v5332_v13  ;;  %v4686_v35 = vmul.f32 %v4523_v25, %v5333_v38  ;;  %v5336_v16 = vld [vmem:[#allocation29_spill] sm:$0xff]  ;;  %v5341_v33 = vld [vmem:[#allocation28_spill] sm:$0xff] }
 0x104   : > { %1364 = vmatpush.bf16.msra.mxu0 %v4293_v43  ;;  %v941_v43 = vmul.f32 %v836_v3, %v3975_v19  ;;  %v4638_v19 = vpop.eup %3341  ;;  %v4690_v31 = vmul.f32 %v4514_v53, %v5334_v2  ;;  %v866_v61 = vsel %vm4660_vm3, %v4516_v37, %v862_v47  ;;  %v978_v50 = vpack.c.bf16 %v4673_v10, %v4656_v15  ;;  %v5345_v23 = vld [vmem:[#allocation32_spill] sm:$0xff]  ;;  %v5347_v38 = vld [vmem:[#allocation33_spill] sm:$0xff] }
 0x105   : > { %v868_v26 = vmul.f32 %v4638_v19, %v4581_v17  ;;  %v4698_v62 = vmul.f32 %v836_v3, %v5335_v34  ;;  %v4701_v39 = vmul.f32 %v846_v41, %v5336_v16  ;;  %v982_v53 = vpack.c.bf16 %v4682_v8, %v4678_v28  ;;  %v5337_v41 = vld [vmem:[#allocation61_spill] sm:$0xff] }
 0x106   : > { %v989_v4 = vpack.c.bf16 %v945_v9, %v941_v43  ;;  %v986_v25 = vpack.c.bf16 %v4690_v31, %v4686_v35  ;;  %v4707_v51 = vmax.f32 %v725_v57, 1e-24  ;;  %v4716_v63 = vmul.f32 %v856_v40, %v5338_v12  ;;  %v5340_v43 = vld [vmem:[#allocation30_spill] sm:$0xff]  ;;  %v2901_v8 = vld [vmem:[#allocation7 + $0x70] sm:$0xf] }
 0x107   : > { %1276 = vmatmul.bf16.gmra.mxu0 %v975_v58  ;;  %v990_v37 = vpack.c.bf16 %v4701_v39, %v4698_v62  ;;  %v4712_v58 = vmax.f32 %v730_v22, 1e-24  ;;  %v4719_v60 = vmul.f32 %v866_v61, %v5339_v21  ;;  %v869_v29 = vmul.f32 %v4638_v19, %v868_v26  ;;  %v5348_v22 = vld [vmem:[#allocation40_spill] sm:$0xff]  ;;  %v3126_v35 = vld [vmem:[#allocation7 + $0x74] sm:$0xf0] }
 0x108   : > { %1365 = vmatpush.bf16.msra.mxu0 %v4307_v49  ;;  %v878_v49 = vmul.f32 %v4627_v24, %v4569_v32  ;;  %v908_v9 = vmul.f32 %v4500_v45, %v5340_v43  ;;  %v912_v14 = vmul.f32 %v4486_v20, %v5341_v33  ;;  %3343 = vrsqrt.f32 %v4707_v51  ;;  %v3104_v45 = vld [vmem:[%s5204_s2 + $0xc8] sm:$0xff]  ;;  %v3125_v31 = vld [vmem:[#allocation7 + $0x74] sm:$0xf]  ;;  %v2903_v62 = vld [vmem:[#allocation7 + $0x78] sm:$0xf0] }
 0x109   : > { %v994_v47 = vpack.c.bf16 %v4719_v60, %v4716_v63  ;;  %3345 = vrsqrt.f32 %v4712_v58  ;;  %v870_v54 = vmul.f32 0.5, %v869_v29  ;;  %v948_v57 = vmul.f32 %v856_v40, %v5345_v23  ;;  %1416 = vmatpush.bf16.msrb.mxu3 %v3104_v45  ;;  %v3124_v63 = vld [vmem:[#allocation7 + $0x64] sm:$0xf0]  ;;  %v3123_v60 = vld [vmem:[#allocation7 + $0x64] sm:$0xf] }
 0x10a   : > { %v879_v3 = vmul.f32 %v4627_v24, %v878_v49  ;;  %v972_v49 = vpack.c.bf16 %v912_v14, %v908_v9  ;;  %v949_v2 = vmul.f32 %v856_v40, %v5347_v38  ;;  %v953_v34 = vmul.f32 %v866_v61, %v5348_v22  ;;  %v5350_v9 = vld [vmem:[#allocation39_spill] sm:$0xff] }
 0x10b   : > { %v871_v13 = vsub.f32 1.5, %v870_v54  ;;  %vm883_vm4 = vweird.f32 %v4569_v32  ;;  %vm884_vm5 = vweird.f32 %v4627_v24  ;;  %vm873_vm6 = vweird.f32 %v4581_v17  ;;  %v3103_v32 = vld [vmem:[%s5204_s2 + $0xc0] sm:$0xff] }
 0x10c   : > { %1366 = vmatpush.bf16.msra.mxu0 %v5329_v7  ;;  %v880_v56 = vmul.f32 0.5, %v879_v3  ;;  %v5346_v7 = vld [vmem:[#allocation37_spill] sm:$0xff]  ;;  %vm874_vm7 = vweird.f32 %v4638_v19  ;;  %vm885_vm8 = vmor %vm883_vm4, %vm884_vm5  ;;  %v993_v29 = vpack.c.bf16 %v953_v34, %v949_v2  ;;  %v5349_v17 = vld [vmem:[#allocation35_spill] sm:$0xff]  ;;  %v920_v33 = vmul.f32 %v4565_v1, %v5350_v9 }
 0x10d   : > { %v952_v59 = vmul.f32 %v866_v61, %v5346_v7  ;;  %v872_v21 = vmul.f32 %v4638_v19, %v871_v13  ;;  %vm875_vm9 = vmor %vm873_vm6, %vm874_vm7  ;;  %v916_v43 = vmul.f32 %v4560_v0, %v5349_v17  ;;  %1417 = vmatpush.bf16.msrb.mxu3 %v3103_v32  ;;  %v5353_v1 = vld [vmem:[#allocation45_spill] sm:$0xff]  ;;  %v5355_v7 = vld [vmem:[#allocation46_spill] sm:$0xff]  ;;  %vm893_vm10 = vweird.f32 %v4707_v51 }
 0x10e   : > { %1291 = vmatmul.bf16.gmra.mxu3 %v987_v6  ;;  %1340 = vmatmul.bf16.gmra.mxu1 %v988_v44  ;;  %v5343_v6 = vld [vmem:[#allocation31_spill] sm:$0xff]  ;;  %v881_v20 = vsub.f32 1.5, %v880_v56  ;;  %v3344_v46 = vpop.eup %3343  ;;  %vm903_vm12 = vweird.f32 %v4712_v58  ;;  %v2906_v39 = vor.u32 %v3125_v31, %v2903_v62  ;;  %v2847_v62 = vld [vmem:[#allocation7 + $0x8] sm:$0xf0] }
 0x10f   : > { %1389 = vmatmul.bf16.gmra.mxu2 %v989_v4  ;;  %v947_v44 = vmul.f32 %v856_v40, %v5343_v6  ;;  %v5344_v4 = vld [vmem:[#allocation36_spill] sm:$0xff]  ;;  %v3346_v16 = vpop.eup %3345  ;;  %v992_v12 = vpack.c.bf16 %v952_v59, %v948_v57  ;;  %v888_v40 = vmul.f32 %v3344_v46, %v4707_v51  ;;  %v5354_v57 = vld [vmem:[#allocation42_spill] sm:$0xff]  ;;  %v5356_v59 = vld [vmem:[#allocation43_spill] sm:$0xff]  ;;  %vm894_vm11 = vweird.f32 %v3344_v46 }
 0x110   : > { %1367 = vmatpush.bf16.msra.mxu0 %v5337_v41  ;;  %v951_v26 = vmul.f32 %v866_v61, %v5344_v4  ;;  %v882_v3 = vmul.f32 %v4627_v24, %v881_v20  ;;  %v898_v61 = vmul.f32 %v3346_v16, %v4712_v58  ;;  %v5357_v22 = vld [vmem:[#allocation51_spill] sm:$0xff]  ;;  %vm904_vm13 = vweird.f32 %v3346_v16  ;;  %vm895_vm14 = vmor %vm893_vm10, %vm894_vm11  ;;  %1634 = vmatpush.bf16.msrb.mxu1 %v2906_v39  ;;  %v4855_v39 = vld [vmem:[#allocation5] ss:$0 sm:$0xff] }
 0x111   : > { %v889_v14 = vmul.f32 %v3344_v46, %v888_v40  ;;  %vm905_vm15 = vmor %vm903_vm12, %vm904_vm13  ;;  %v5360_v51 = vld [vmem:[#allocation59_spill] sm:$0xff] }
 0x112   : > { %v991_v41 = vpack.c.bf16 %v951_v26, %v947_v44  ;;  %v899_v56 = vmul.f32 %v3346_v16, %v898_v61  ;;  %v886_v54 = vsel %vm885_vm8, %v4627_v24, %v882_v3  ;;  %v5352_v44 = vld [vmem:[#allocation53_spill] sm:$0xff]  ;;  %v976_v26 = vpack.c.bf16 %v920_v33, %v916_v43  ;;  %v5358_v3 = vld [vmem:[#allocation50_spill] sm:$0xff]  ;;  %v3111_v31 = vld [vmem:[#allocation7 + $0x4] sm:$0xf] }
 0x113   : > { %v4761_v45 = vmul.f32 %v886_v54, %v5352_v44  ;;  %v890_v20 = vmul.f32 0.5, %v889_v14  ;;  %v960_v13 = vmul.f32 %v886_v54, %v5356_v59  ;;  %v5359_v43 = vld [vmem:[#allocation57_spill] sm:$0xff]  ;;  %v5361_v14 = vld [vmem:[#allocation48_spill] sm:$0xff] }
 0x114   : > { %1368 = vmatpush.bf16.msra.mxu0 %v5342_v5  ;;  %v876_v5 = vsel %vm875_vm9, %v4638_v19, %v872_v21  ;;  %v900_v4 = vmul.f32 0.5, %v899_v56  ;;  %v959_v19 = vmul.f32 %v886_v54, %v5354_v57  ;;  %v3122_v59 = vld [vmem:[#allocation7 + $0x54] sm:$0xf0] }
 0x115   : > { %v955_v23 = vmul.f32 %v876_v5, %v5353_v1  ;;  %v956_v24 = vmul.f32 %v876_v5, %v5355_v7  ;;  %v891_v38 = vsub.f32 1.5, %v890_v20  ;;  %v957_v34 = vmul.f32 %v876_v5, %v5357_v22  ;;  %v5365_v20 = vld [vmem:[#allocation52_spill] sm:$0xff] }
 0x116   : > { %v901_v2 = vsub.f32 1.5, %v900_v4  ;;  %v2895_v7 = vld [vmem:[#allocation7 + $0x68] sm:$0xf0] }
 0x117   : > { %1320 = vmatmul.bf16.vlgmr.msrb.gmra.mxu0 %v972_v49  ;;  %v5351_v49 = vld [vmem:[#allocation54_spill] sm:$0xff]  ;;  %v996_v21 = vpack.c.bf16 %v960_v13, %v956_v24  ;;  %v892_v40 = vmul.f32 %v3344_v46, %v891_v38  ;;  %v2885_v24 = vld [vmem:[#allocation7 + $0x50] sm:$0xf]  ;;  %v2898_v13 = vor.u32 %v3123_v60, %v2895_v7  ;;  %v3121_v38 = vld [vmem:[#allocation7 + $0x54] sm:$0xf] }
 0x118   : > { %v4758_v6 = vmul.f32 %v876_v5, %v5351_v49  ;;  %v902_v61 = vmul.f32 %v3346_v16, %v901_v2  ;;  %v5362_v5 = vld [vmem:[#allocation55_spill] sm:$0xff]  ;;  %v5363_v49 = vld [vmem:[#allocation49_spill] sm:$0xff]  ;;  %v2887_v2 = vld [vmem:[#allocation7 + $0x58] sm:$0xf0] }
 0x119   : > { %v896_v32 = vsel %vm895_vm14, %v3344_v46, %v892_v40  ;;  %1635 = vmatpush.bf16.msrb.mxu1 %v2898_v13 }
 0x11a   : > { %v998_v0 = vpack.c.bf16 %v4761_v45, %v4758_v6  ;;  %v906_v17 = vsel %vm905_vm15, %v3346_v16, %v902_v61  ;;  %v4774_v9 = vmul.f32 %v896_v32, %v5359_v43  ;;  %v963_v56 = vmul.f32 %v896_v32, %v5361_v14  ;;  %v5364_v16 = vld [vmem:[#allocation56_spill] sm:$0xff]  ;;  %v2877_v6 = vld [vmem:[#allocation7 + $0x40] sm:$0xf] }
 0x11b   : > { %v4777_v33 = vmul.f32 %v906_v17, %v5360_v51  ;;  %v964_v46 = vmul.f32 %v896_v32, %v5363_v49  ;;  %v968_v44 = vmul.f32 %v906_v17, %v5364_v16  ;;  %v965_v4 = vmul.f32 %v896_v32, %v5365_v20  ;;  %v3120_v45 = vld [vmem:[#allocation7 + $0x44] sm:$0xf0]  ;;  %v2869_v61 = vld [vmem:[#allocation7 + $0x30] sm:$0xf]  ;;  %v3117_v32 = vld [vmem:[#allocation7 + $0x34] sm:$0xf] }
 0x11c   : > { %v2863_v16 = vld [vmem:[#allocation7 + $0x28] sm:$0xf0]  ;;  %v2853_v20 = vld [vmem:[#allocation7 + $0x10] sm:$0xf] }
 0x11d   : > { %v1002_v58 = vpack.c.bf16 %v4777_v33, %v4774_v9  ;;  %v1000_v57 = vpack.c.bf16 %v968_v44, %v964_v46  ;;  %v2850_v9 = vor.u32 %v3111_v31, %v2847_v62 }
 0x11e   : > { %1296 = vmatmul.bf16.gmra.mxu3 %v991_v41  ;;  %1345 = vmatmul.bf16.gmra.mxu1 %v992_v12  ;;  %v961_v41 = vmul.f32 %v886_v54, %v5358_v3  ;;  %v995_v12 = vpack.c.bf16 %v959_v19, %v955_v23  ;;  %v967_v54 = vmul.f32 %v906_v17, %v5362_v5  ;;  %v3116_v5 = vld [vmem:[#allocation7 + $0x24] sm:$0xf0] }
 0x11f   : > { %1394 = vmatmul.bf16.gmra.mxu2 %v993_v29  ;;  %v2890_v3 = vor.u32 %v3121_v38, %v2887_v2 }
 0x120   : > { %v997_v29 = vpack.c.bf16 %v961_v41, %v957_v34  ;;  %v999_v23 = vpack.c.bf16 %v967_v54, %v963_v56  ;;  %v2886_v34 = vor.u32 %v3122_v59, %v2885_v24  ;;  %v2861_v56 = vld [vmem:[#allocation7 + $0x20] sm:$0xf]  ;;  %v3115_v54 = vld [vmem:[#allocation7 + $0x24] sm:$0xf] }
 0x121   : > { %1636 = vmatpush.bf16.msrb.mxu1 %v2890_v3  ;;  %v2862_v46 = vor.u32 %v3116_v5, %v2861_v56  ;;  %v2866_v44 = vor.u32 %v3115_v54, %v2863_v16 }
 0x127   : > { %1325 = vmatmul.bf16.gmra.mxu0 %v976_v26  ;;  %v5366_v26 = vld [vmem:[#allocation58_spill] sm:$0xff] }
 0x128   : > { %v969_v1 = vmul.f32 %v906_v17, %v5366_v26  ;;  %v2871_v17 = vld [vmem:[#allocation7 + $0x38] sm:$0xf0]  ;;  %v3113_v26 = vld [vmem:[#allocation7 + $0x14] sm:$0xf] }
 0x129   : > { %v2874_v14 = vor.u32 %v3117_v32, %v2871_v17 }
 0x12a   : > { %v1001_v19 = vpack.c.bf16 %v969_v1, %v965_v4  ;;  %v3114_v4 = vld [vmem:[#allocation7 + $0x14] sm:$0xf0]  ;;  %v2855_v1 = vld [vmem:[#allocation7 + $0x18] sm:$0xf0] }
 0x12e   : > { %1301 = vmatmul.bf16.gmra.mxu3 %v995_v12  ;;  %1350 = vmatmul.bf16.gmra.mxu1 %v996_v21  ;;  %v2878_v12 = vor.u32 %v3120_v45, %v2877_v6  ;;  %v2879_v21 = vld [vmem:[#allocation7 + $0x48] sm:$0xf0] }
 0x12f   : > { %1399 = vmatmul.bf16.gmra.mxu2 %v997_v29  ;;  %v3118_v29 = vld [vmem:[#allocation7 + $0x34] sm:$0xf0] }
 0x130   : > { %v2870_v51 = vor.u32 %v3118_v29, %v2869_v61 }
 0x137   : > { %1369 = vmatmul.bf16.vlgmr.msra.gmra.mxu0 %v973_v18 }
 0x13e   : > { %1306 = vmatmul.bf16.gmra.mxu3 %v999_v23  ;;  %1355 = vmatmul.bf16.gmra.mxu1 %v1000_v57  ;;  %v2854_v57 = vor.u32 %v3114_v4, %v2853_v20 }
 0x13f   : > { %1404 = vmatmul.bf16.gmra.mxu2 %v1001_v19  ;;  %v2858_v19 = vor.u32 %v3113_v26, %v2855_v1 }
 0x147   : > { %1374 = vmatmul.bf16.gmra.mxu0 %v977_v42 }
 0x14e   : > { %1418 = vmatmul.bf16.vlgmr.msrb.gmra.mxu3 %v974_v27 }
 0x15e   : > { %1423 = vmatmul.bf16.gmra.mxu3 %v978_v50  ;;  %v2902_v50 = vor.u32 %v3126_v35, %v2901_v8  ;;  %v2845_v8 = vld [vmem:[#allocation7] sm:$0xf]  ;;  %v3112_v35 = vld [vmem:[#allocation7 + $0x4] sm:$0xf0] }
 0x160   : > { %1585 = vmatpush.bf16.msrb.mxu0 %v2902_v50  ;;  %v2846_v50 = vor.u32 %v3112_v35, %v2845_v8 }
 0x16b   : > { %v1331_v24 = vpop.f32.mrf.mxu1 }
 0x16e   : > { %1428 = vmatmul.bf16.gmra.mxu3 %v982_v53 }
 0x171   : > { %v4802_v55 = vpop.f32.mrf.mxu3 }
 0x174   : > { %v4804_v36 = vpop.f32.mrf.mxu0 }
 0x179   : > { %v4806_v18 = vpop.f32.mrf.mxu3 }
 0x17c   : > { %v4811_v11 = vpop.f32.mrf.mxu0 }
 0x17d   : > { %v1275_v7 = vadd.f32 %v4855_v39, %v4811_v11 }
 0x17e   : > { %1433 = vmatmul.bf16.gmra.mxu3 %v986_v25 }
 0x181   : > { %v4813_v30 = vpop.f32.mrf.mxu3 }
 0x184   : > { %v4817_v48 = vpop.f32.mrf.mxu0 }
 0x189   : > { %v4815_v42 = vpop.f32.mrf.mxu3 }
 0x18c   : > { %v4824_v15 = vpop.f32.mrf.mxu0 }
 0x18e   : > { %1438 = vmatmul.bf16.gmra.mxu3 %v990_v37  ;;  %v2893_v37 = vld [vmem:[#allocation7 + $0x60] sm:$0xf] }
 0x191   : > { %v4822_v52 = vpop.f32.mrf.mxu3 }
 0x194   : > { %v4831_v10 = vpop.f32.mrf.mxu0 }
 0x199   : > { %v4826_v27 = vpop.f32.mrf.mxu3 }
 0x19c   : > { %v4835_v53 = vpop.f32.mrf.mxu0 }
 0x19d   : > { %v1324_v13 = vadd.f32 %v4835_v53, %v1275_v7  ;;  %v1280_v53 = vadd.f32 %v4855_v39, %v4824_v15  ;;  %v1285_v15 = vadd.f32 %v4855_v39, %v4806_v18  ;;  %v1288_v18 = vadd.f32 %v4855_v39, %v4813_v30 }
 0x19e   : > { %1443 = vmatmul.bf16.gmra.mxu3 %v994_v47  ;;  %v2894_v47 = vor.u32 %v3124_v63, %v2893_v37  ;;  %v1273_v37 = vadd.f32 %v4855_v39, %v4804_v36  ;;  %v1333_v36 = vpop.f32.mrf.mxu1 }
 0x19f   : > { %v1334_v1 = vadd.f32 %v1333_v36, %v1285_v15 }
 0x1a0   : > { %1586 = vmatpush.bf16.msrb.mxu0 %v2894_v47  ;;  %v1322_v47 = vadd.f32 %v4831_v10, %v1273_v37  ;;  %v1278_v10 = vadd.f32 %v4855_v39, %v4817_v48  ;;  %v3134_v48 = vld [vmem:[#allocation10 + $0x38] sm:$0xff] }
 0x1a1   : > { %v4833_v28 = vpop.f32.mrf.mxu3  ;;  %1791 = vmatpush.bf16.msrb.mxu2 %v3134_v48 }
 0x1a4   : > { %v4844_v41 = vpop.f32.mrf.mxu0  ;;  %1587 = vmatpush.bf16.msrb.mxu0 %v2886_v34  ;;  %v1380_v34 = vpop.f32.mrf.mxu2 }
 0x1a6   : > { %v1336_v56 = vpop.f32.mrf.mxu1 }
 0x1a7   : > { %v1337_v37 = vadd.f32 %v1336_v56, %v1288_v18  ;;  %v1298_v56 = vadd.f32 %v4855_v39, %v4833_v28 }
 0x1a8   : > { %1588 = vmatpush.bf16.msrb.mxu0 %v2878_v12 }
 0x1a9   : > { %v4837_v25 = vpop.f32.mrf.mxu3 }
 0x1ac   : > { %v1328_v49 = vpop.f32.mrf.mxu0  ;;  %1589 = vmatpush.bf16.msrb.mxu0 %v2870_v51  ;;  %v1382_v11 = vpop.f32.mrf.mxu2 }
 0x1ad   : > { %v1329_v17 = vadd.f32 %v1328_v49, %v1280_v53  ;;  %v1383_v35 = vadd.f32 %v1382_v11, %v1334_v1 }
 0x1ae   : > { %1448 = vmatmul.bf16.gmra.mxu3 %v998_v0  ;;  %v3119_v0 = vld [vmem:[#allocation7 + $0x44] sm:$0xf]  ;;  %v1338_v4 = vpop.f32.mrf.mxu1 }
 0x1af   : > { %v2882_v40 = vor.u32 %v3119_v0, %v2879_v21 }
 0x1b0   : > { %1590 = vmatpush.bf16.msrb.mxu0 %v2862_v46 }
 0x1b1   : > { %v4842_v22 = vpop.f32.mrf.mxu3  ;;  %1637 = vmatpush.bf16.msrb.mxu1 %v2882_v40  ;;  %v1327_v40 = vadd.f32 %v4844_v41, %v1278_v10  ;;  %v1283_v41 = vadd.f32 %v4855_v39, %v4802_v55 }
 0x1b4   : > { %1591 = vmatpush.bf16.msrb.mxu0 %v2854_v57  ;;  %v1370_v33 = vpop.f32.mrf.mxu0  ;;  %v1385_v46 = vpop.f32.mrf.mxu2 }
 0x1b5   : > { %1638 = vmatpush.bf16.msrb.mxu1 %v2874_v14  ;;  %v1371_v59 = vadd.f32 %v1370_v33, %v1322_v47 }
 0x1b6   : > { %v1341_v62 = vpop.f32.mrf.mxu1 }
 0x1b8   : > { %1592 = vmatpush.bf16.msrb.mxu0 %v2846_v50  ;;  %v3133_v50 = vld [vmem:[#allocation10 + $0x30] sm:$0xff] }
 0x1b9   : > { %v4846_v43 = vpop.f32.mrf.mxu3  ;;  %1639 = vmatpush.bf16.msrb.mxu1 %v2866_v44  ;;  %v1332_v44 = vadd.f32 %v1331_v24, %v1283_v41  ;;  %1792 = vmatpush.bf16.msrb.mxu2 %v3133_v50 }
 0x1bb   : > { %v1381_v57 = vadd.f32 %v1380_v34, %v1332_v44 }
 0x1bc   : > { %v1372_v63 = vpop.f32.mrf.mxu0 }
 0x1bd   : > { %1640 = vmatpush.bf16.msrb.mxu1 %v2858_v19  ;;  %v1373_v2 = vadd.f32 %v1372_v63, %v1324_v13  ;;  %v1387_v19 = vpop.f32.mrf.mxu2  ;;  %v3132_v13 = vld [vmem:[#allocation10 + $0x28] sm:$0xff] }
 0x1be   : > { %1453 = vmatmul.bf16.gmra.mxu3 %v1002_v58  ;;  %1793 = vmatpush.bf16.msrb.mxu2 %v3132_v13 }
 0x1c1   : > { %v4851_v23 = vpop.f32.mrf.mxu3  ;;  %1641 = vmatpush.bf16.msrb.mxu1 %v2850_v9  ;;  %v1290_v9 = vadd.f32 %v4855_v39, %v4815_v42  ;;  %v1293_v42 = vadd.f32 %v4855_v39, %v4822_v52 }
 0x1c3   : > { %v1339_v24 = vadd.f32 %v1338_v4, %v1290_v9 }
 0x1c4   : > { %v1375_v45 = vpop.f32.mrf.mxu0 }
 0x1c5   : > { %v1376_v29 = vadd.f32 %v1375_v45, %v1327_v40  ;;  %v1390_v63 = vpop.f32.mrf.mxu2  ;;  %v1388_v30 = vadd.f32 %v1387_v19, %v1339_v24  ;;  %v1295_v45 = vadd.f32 %v4855_v39, %v4826_v27  ;;  %v3130_v27 = vld [vmem:[#allocation10 + $0x18] sm:$0xff]  ;;  %v3129_v19 = vld [vmem:[#allocation10 + $0x10] sm:$0xff] }
 0x1c9   : > { %v4853_v58 = vpop.f32.mrf.mxu3 }
 0x1ca   : > { %v1310_v13 = vadd.f32 %v4855_v39, %v4853_v58 }
 0x1cc   : > { %v1377_v32 = vpop.f32.mrf.mxu0 }
 0x1cd   : > { %v1378_v14 = vadd.f32 %v1377_v32, %v1329_v17 }
 0x1d1   : > { %v1419_v60 = vpop.f32.mrf.mxu3 }
 0x1d2   : > { %v1420_v38 = vadd.f32 %v1419_v60, %v1371_v59  ;;  %v1386_v59 = vadd.f32 %v1385_v46, %v1337_v37 }
 0x1d4   : > { %3347 = vtanh.f32 %v1420_v38  ;;  %v1343_v38 = vpop.f32.mrf.mxu1 }
 0x1d5   : > { %v1344_v40 = vadd.f32 %v1343_v38, %v1295_v45 }
 0x1d9   : > { %v1421_v3 = vpop.f32.mrf.mxu3 }
 0x1da   : > { %v1422_v6 = vadd.f32 %v1421_v3, %v1373_v2  ;;  %v3348_v0 = vpop.eup %3347 }
 0x1dc   : > { %3349 = vtanh.f32 %v1422_v6  ;;  %v1392_v6 = vpop.f32.mrf.mxu2  ;;  %v1346_v10 = vpop.f32.mrf.mxu1 }
 0x1dd   : > { %v1393_v17 = vadd.f32 %v1392_v6, %v1344_v40  ;;  %v1347_v41 = vadd.f32 %v1346_v10, %v1298_v56  ;;  %v1499_v40 = vld [vmem:[#allocation8] sm:$0x3]  ;;  %v3164_v56 = vld [vmem:[#allocation11 + $0xec] sm:$0xf] }
 0x1e1   : > { %v1424_v12 = vpop.f32.mrf.mxu3 }
 0x1e2   : > { %v3350_v21 = vpop.eup %3349  ;;  %v1425_v51 = vadd.f32 %v1424_v12, %v1376_v29 }
 0x1e3   : > { %v1475_v61 = vpack.c.bf16 %v3350_v21, %v3348_v0  ;;  %v1342_v0 = vadd.f32 %v1341_v62, %v1293_v42 }
 0x1e4   : > { %3351 = vtanh.f32 %v1425_v51  ;;  %v1395_v29 = vpop.f32.mrf.mxu2 }
 0x1e5   : > { %1593 = vmatmul.bf16.vlgmr.msrb.gmra.mxu0 %v1475_v61  ;;  %1642 = vmatmul.bf16.vlgmr.msrb.gmra.mxu1 %v1475_v61  ;;  %v3131_v61 = vld [vmem:[#allocation10 + $0x20] sm:$0xff]  ;;  %v1391_v53 = vadd.f32 %v1390_v63, %v1342_v0  ;;  %v3128_v63 = vld [vmem:[#allocation10 + $0x8] sm:$0xff] }
 0x1e6   : > { %1794 = vmatpush.bf16.msrb.mxu2 %v3131_v61  ;;  %v4893_v61 = vperm.slane %v1499_v40, 0 }
 0x1e9   : > { %v1426_v5 = vpop.f32.mrf.mxu3 }
 0x1ea   : > { %v1427_v54 = vadd.f32 %v1426_v5, %v1378_v14  ;;  %v3352_v16 = vpop.eup %3351  ;;  %v1348_v14 = vpop.f32.mrf.mxu1  ;;  %1795 = vmatpush.bf16.msrb.mxu2 %v3130_v27 }
 0x1ec   : > { %3353 = vtanh.f32 %v1427_v54  ;;  %v1397_v5 = vpop.f32.mrf.mxu2  ;;  %v1300_v54 = vadd.f32 %v4855_v39, %v4837_v25  ;;  %v1303_v25 = vadd.f32 %v4855_v39, %v4842_v22 }
 0x1ee   : > { %v1349_v44 = vadd.f32 %v1348_v14, %v1300_v54  ;;  %1796 = vmatpush.bf16.msrb.mxu2 %v3129_v19  ;;  %v3165_v14 = vld [vmem:[#allocation11 + $0xec] sm:$0xf0] }
 0x1f1   : > { %v1429_v20 = vpop.f32.mrf.mxu3 }
 0x1f2   : > { %v3354_v49 = vpop.eup %3353  ;;  %v1430_v8 = vadd.f32 %v1429_v20, %v1381_v57  ;;  %v1396_v20 = vadd.f32 %v1395_v29, %v1347_v41  ;;  %1797 = vmatpush.bf16.msrb.mxu2 %v3128_v63 }
 0x1f3   : > { %v1476_v26 = vpack.c.bf16 %v3354_v49, %v3352_v16  ;;  %v1351_v49 = vpop.f32.mrf.mxu1 }
 0x1f4   : > { %3355 = vtanh.f32 %v1430_v8  ;;  %v1400_v1 = vpop.f32.mrf.mxu2 }
 0x1f5   : > { %1598 = vmatmul.bf16.gmra.mxu0 %v1476_v26  ;;  %1647 = vmatmul.bf16.gmra.mxu1 %v1476_v26  ;;  %v1398_v26 = vadd.f32 %v1397_v5, %v1349_v44  ;;  %v3063_v5 = vld [vmem:[#allocation11 + $0xf8] sm:$0xf0]  ;;  %v3163_v44 = vld [vmem:[#allocation11 + $0xe4] sm:$0xf] }
 0x1f6   : > { %v3066_v54 = vor.u32 %v3164_v56, %v3063_v5  ;;  %v3152_v5 = vld [vmem:[#allocation11 + $0x8c] sm:$0xf] }
 0x1f9   : > { %v1431_v31 = vpop.f32.mrf.mxu3 }
 0x1fa   : > { %v1432_v55 = vadd.f32 %v1431_v31, %v1383_v35  ;;  %v3356_v33 = vpop.eup %3355  ;;  %v1305_v35 = vadd.f32 %v4855_v39, %v4846_v43  ;;  %v1308_v43 = vadd.f32 %v4855_v39, %v4851_v23 }
 0x1fb   : > { %v1353_v8 = vpop.f32.mrf.mxu1 }
 0x1fc   : > { %3357 = vtanh.f32 %v1432_v55  ;;  %v1352_v55 = vadd.f32 %v1351_v49, %v1303_v25  ;;  %v1402_v62 = vpop.f32.mrf.mxu2 }
 0x1fe   : > { %v1401_v37 = vadd.f32 %v1400_v1, %v1352_v55  ;;  %v3160_v55 = vld [vmem:[#allocation11 + $0xcc] sm:$0xf] }
 0x201   : > { %v1434_v60 = vpop.f32.mrf.mxu3 }
 0x202   : > { %v3358_v47 = vpop.eup %3357  ;;  %v1435_v2 = vadd.f32 %v1434_v60, %v1386_v59 }
 0x203   : > { %v1477_v7 = vpack.c.bf16 %v3358_v47, %v3356_v33  ;;  %v1354_v33 = vadd.f32 %v1353_v8, %v1305_v35  ;;  %v1356_v22 = vpop.f32.mrf.mxu1  ;;  %v3037_v8 = vld [vmem:[#allocation11 + $0xc0] sm:$0xf]  ;;  %v3161_v35 = vld [vmem:[#allocation11 + $0xcc] sm:$0xf0] }
 0x204   : > { %3359 = vtanh.f32 %v1435_v2  ;;  %v1405_v59 = vpop.f32.mrf.mxu2  ;;  %v1357_v2 = vadd.f32 %v1356_v22, %v1308_v43 }
 0x205   : > { %1603 = vmatmul.bf16.gmra.mxu0 %v1477_v7  ;;  %1652 = vmatmul.bf16.gmra.mxu1 %v1477_v7  ;;  %v1403_v47 = vadd.f32 %v1402_v62, %v1354_v33 }
 0x206   : > { %v1406_v45 = vadd.f32 %v1405_v59, %v1357_v2 }
 0x209   : > { %v1436_v34 = vpop.f32.mrf.mxu3 }
 0x20a   : > { %v1437_v3 = vadd.f32 %v1436_v34, %v1388_v30  ;;  %v3360_v36 = vpop.eup %3359 }
 0x20c   : > { %3361 = vtanh.f32 %v1437_v3  ;;  %v1358_v3 = vpop.f32.mrf.mxu1  ;;  %v1407_v0 = vpop.f32.mrf.mxu2 }
 0x20d   : > { %v1359_v42 = vadd.f32 %v1358_v3, %v1310_v13 }
 0x211   : > { %v1439_v12 = vpop.f32.mrf.mxu3 }
 0x212   : > { %v3362_v21 = vpop.eup %3361  ;;  %v1440_v32 = vadd.f32 %v1439_v12, %v1391_v53  ;;  %v1408_v12 = vadd.f32 %v1407_v0, %v1359_v42  ;;  %v4895_v53 = vperm.slane %v1499_v40, 1  ;;  %v3031_v42 = vld [vmem:[#allocation11 + $0xb8] sm:$0xf0]  ;;  %v3158_v40 = vld [vmem:[#allocation11 + $0xb4] sm:$0xf0] }
 0x213   : > { %v1478_v11 = vpack.c.bf16 %v3362_v21, %v3360_v36  ;;  %v3127_v36 = vld [vmem:[#allocation10] sm:$0xff] }
 0x214   : > { %3363 = vtanh.f32 %v1440_v32  ;;  %1798 = vmatpush.bf16.msrb.mxu2 %v3127_v36 }
 0x215   : > { %1608 = vmatmul.bf16.gmra.mxu0 %v1478_v11  ;;  %1657 = vmatmul.bf16.gmra.mxu1 %v1478_v11 }
 0x218   : > { %2213 = vmatpush.bf16.msra.mxu2 %v3066_v54  ;;  %v3015_v54 = vld [vmem:[#allocation11 + $0x98] sm:$0xf0] }
 0x219   : > { %v1441_v51 = vpop.f32.mrf.mxu3 }
 0x21a   : > { %v1442_v52 = vadd.f32 %v1441_v51, %v1393_v17  ;;  %v3364_v48 = vpop.eup %3363 }
 0x21c   : > { %3365 = vtanh.f32 %v1442_v52  ;;  %v3053_v52 = vld [vmem:[#allocation11 + $0xe0] sm:$0xf] }
 0x21d   : > { %v3054_v27 = vor.u32 %v3165_v14, %v3053_v52  ;;  %v3005_v14 = vld [vmem:[#allocation11 + $0x80] sm:$0xf] }
 0x21f   : > { %2066 = vmatpush.bf16.msra.mxu3 %v3054_v27  ;;  %v3153_v27 = vld [vmem:[#allocation11 + $0x8c] sm:$0xf0] }
 0x220   : > { %v3006_v56 = vor.u32 %v3153_v27, %v3005_v14  ;;  %v2967_v14 = vld [vmem:[#allocation11 + $0x38] sm:$0xf0] }
 0x221   : > { %v1444_v46 = vpop.f32.mrf.mxu3 }
 0x222   : > { %v3366_v15 = vpop.eup %3365  ;;  %v1445_v4 = vadd.f32 %v1444_v46, %v1396_v20  ;;  %v3055_v20 = vld [vmem:[#allocation11 + $0xf0] sm:$0xf0] }
 0x223   : > { %v1479_v16 = vpack.c.bf16 %v3366_v15, %v3364_v48  ;;  %v3058_v49 = vor.u32 %v3163_v44, %v3055_v20  ;;  %v3151_v20 = vld [vmem:[#allocation11 + $0x84] sm:$0xf] }
 0x224   : > { %3367 = vtanh.f32 %v1445_v4  ;;  %v3061_v4 = vld [vmem:[#allocation11 + $0xe8] sm:$0xf] }
 0x225   : > { %1613 = vmatmul.bf16.gmra.mxu0 %v1479_v16  ;;  %1662 = vmatmul.bf16.gmra.mxu1 %v1479_v16 }
 0x226   : > { %2115 = vmatpush.bf16.msra.mxu0 %v3058_v49  ;;  %v3007_v49 = vld [vmem:[#allocation11 + $0x90] sm:$0xf0] }
 0x229   : > { %v1446_v57 = vpop.f32.mrf.mxu3 }
 0x22a   : > { %v1447_v28 = vadd.f32 %v1446_v57, %v1398_v26  ;;  %v3368_v31 = vpop.eup %3367  ;;  %v3166_v26 = vld [vmem:[#allocation11 + $0xf4] sm:$0xf0] }
 0x22b   : > { %v3062_v1 = vor.u32 %v3166_v26, %v3061_v4  ;;  %v3010_v4 = vor.u32 %v3151_v20, %v3007_v49  ;;  %v3013_v26 = vld [vmem:[#allocation11 + $0x88] sm:$0xf] }
 0x22c   : > { %3369 = vtanh.f32 %v1447_v28 }
 0x22d   : > { %2164 = vmatpush.bf16.msra.mxu1 %v3062_v1  ;;  %v3154_v1 = vld [vmem:[#allocation11 + $0x94] sm:$0xf0] }
 0x231   : > { %v1449_v50 = vpop.f32.mrf.mxu3 }
 0x232   : > { %v3370_v18 = vpop.eup %3369  ;;  %v1450_v60 = vadd.f32 %v1449_v50, %v1401_v37  ;;  %v3047_v50 = vld [vmem:[#allocation11 + $0xd8] sm:$0xf0] }
 0x233   : > { %v1480_v9 = vpack.c.bf16 %v3370_v18, %v3368_v31  ;;  %v3038_v31 = vor.u32 %v3161_v35, %v3037_v8  ;;  %v3050_v18 = vor.u32 %v3160_v55, %v3047_v50  ;;  %v2989_v35 = vld [vmem:[#allocation11 + $0x60] sm:$0xf]  ;;  %v3148_v50 = vld [vmem:[#allocation11 + $0x6c] sm:$0xf] }
 0x234   : > { %3371 = vtanh.f32 %v1450_v60  ;;  %v3159_v60 = vld [vmem:[#allocation11 + $0xc4] sm:$0xf] }
 0x235   : > { %1618 = vmatmul.bf16.gmra.mxu0 %v1480_v9  ;;  %1667 = vmatmul.bf16.gmra.mxu1 %v1480_v9 }
 0x236   : > { %2067 = vmatpush.bf16.msra.mxu3 %v3038_v31  ;;  %2214 = vmatpush.bf16.msra.mxu2 %v3050_v18  ;;  %v3149_v31 = vld [vmem:[#allocation11 + $0x6c] sm:$0xf0]  ;;  %v2999_v18 = vld [vmem:[#allocation11 + $0x78] sm:$0xf0] }
 0x237   : > { %v2990_v55 = vor.u32 %v3149_v31, %v2989_v35  ;;  %v2941_v31 = vld [vmem:[#allocation11] sm:$0xf] }
 0x239   : > { %v1451_v7 = vpop.f32.mrf.mxu3 }
 0x23a   : > { %v1452_v24 = vadd.f32 %v1451_v7, %v1403_v47  ;;  %v3372_v38 = vpop.eup %3371  ;;  %v3039_v47 = vld [vmem:[#allocation11 + $0xd0] sm:$0xf0]  ;;  %v3045_v7 = vld [vmem:[#allocation11 + $0xc8] sm:$0xf] }
 0x23b   : > { %v3042_v22 = vor.u32 %v3159_v60, %v3039_v47  ;;  %v3147_v47 = vld [vmem:[#allocation11 + $0x64] sm:$0xf] }
 0x23c   : > { %3373 = vtanh.f32 %v1452_v24  ;;  %v3162_v24 = vld [vmem:[#allocation11 + $0xd4] sm:$0xf0] }
 0x23d   : > { %v3046_v43 = vor.u32 %v3162_v24, %v3045_v7  ;;  %2116 = vmatpush.bf16.msra.mxu0 %v3042_v22  ;;  %v2991_v22 = vld [vmem:[#allocation11 + $0x70] sm:$0xf0]  ;;  %v2997_v24 = vld [vmem:[#allocation11 + $0x68] sm:$0xf] }
 0x23e   : > { %v2994_v7 = vor.u32 %v3147_v47, %v2991_v22  ;;  %v3135_v22 = vld [vmem:[#allocation11 + $0x4] sm:$0xf] }
 0x23f   : > { %2165 = vmatpush.bf16.msra.mxu1 %v3046_v43  ;;  %v3150_v43 = vld [vmem:[#allocation11 + $0x74] sm:$0xf0] }
 0x241   : > { %v1454_v30 = vpop.f32.mrf.mxu3 }
 0x242   : > { %v3374_v34 = vpop.eup %3373  ;;  %v1455_v10 = vadd.f32 %v1454_v30, %v1406_v45  ;;  %v3021_v30 = vld [vmem:[#allocation11 + $0xa0] sm:$0xf] }
 0x243   : > { %v1481_v6 = vpack.c.bf16 %v3374_v34, %v3372_v38  ;;  %v3157_v34 = vld [vmem:[#allocation11 + $0xac] sm:$0xf0] }
 0x244   : > { %3375 = vtanh.f32 %v1455_v10  ;;  %v3022_v3 = vor.u32 %v3157_v34, %v3021_v30  ;;  %v2973_v34 = vld [vmem:[#allocation11 + $0x40] sm:$0xf] }
 0x245   : > { %1623 = vmatmul.bf16.gmra.mxu0 %v1481_v6  ;;  %1672 = vmatmul.bf16.gmra.mxu1 %v1481_v6  ;;  %v3156_v6 = vld [vmem:[#allocation11 + $0xac] sm:$0xf] }
 0x246   : > { %v3034_v45 = vor.u32 %v3156_v6, %v3031_v42  ;;  %2068 = vmatpush.bf16.msra.mxu3 %v3022_v3  ;;  %v3145_v3 = vld [vmem:[#allocation11 + $0x4c] sm:$0xf0]  ;;  %v3144_v42 = vld [vmem:[#allocation11 + $0x4c] sm:$0xf] }
 0x247   : > { %v2974_v6 = vor.u32 %v3145_v3, %v2973_v34 }
 0x248   : > { %2215 = vmatpush.bf16.msra.mxu2 %v3034_v45  ;;  %v2983_v45 = vld [vmem:[#allocation11 + $0x58] sm:$0xf0] }
 0x249   : > { %v1456_v23 = vpop.f32.mrf.mxu3 }
 0x24a   : > { %v1457_v21 = vadd.f32 %v1456_v23, %v1408_v12  ;;  %v3376_v58 = vpop.eup %3375  ;;  %2069 = vmatpush.bf16.msra.mxu3 %v3006_v56 }
 0x24c   : > { %3377 = vtanh.f32 %v1457_v21  ;;  %v3155_v21 = vld [vmem:[#allocation11 + $0xa4] sm:$0xf] }
 0x24e   : > { %2070 = vmatpush.bf16.msra.mxu3 %v2990_v55  ;;  %v3137_v55 = vld [vmem:[#allocation11 + $0xc] sm:$0xf0] }
 0x252   : > { %v3378_v39 = vpop.eup %3377  ;;  %2071 = vmatpush.bf16.msra.mxu3 %v2974_v6 }
 0x253   : > { %v1482_v11 = vpack.c.bf16 %v3378_v39, %v3376_v58  ;;  %v3023_v58 = vld [vmem:[#allocation11 + $0xb0] sm:$0xf0] }
 0x254   : > { %v3026_v39 = vor.u32 %v3155_v21, %v3023_v58  ;;  %v3143_v58 = vld [vmem:[#allocation11 + $0x44] sm:$0xf] }
 0x255   : > { %1628 = vmatmul.bf16.gmra.mxu0 %v1482_v11  ;;  %1677 = vmatmul.bf16.gmra.mxu1 %v1482_v11  ;;  %v3029_v11 = vld [vmem:[#allocation11 + $0xa8] sm:$0xf] }
 0x256   : > { %2117 = vmatpush.bf16.msra.mxu0 %v3026_v39  ;;  %v2975_v39 = vld [vmem:[#allocation11 + $0x50] sm:$0xf0] }
 0x25a   : > { %2118 = vmatpush.bf16.msra.mxu0 %v3010_v4 }
 0x25e   : > { %2119 = vmatpush.bf16.msra.mxu0 %v2994_v7  ;;  %v2943_v7 = vld [vmem:[#allocation11 + $0x10] sm:$0xf0] }
 0x262   : > { %v1594_v29 = vpop.f32.mrf.mxu0  ;;  %v1643_v32 = vpop.f32.mrf.mxu1 }
 0x263   : > { %v1595_v17 = vadd.f32 %v1594_v29, %v4893_v61  ;;  %v1644_v51 = vadd.f32 %v1643_v32, %v4895_v53  ;;  %v3030_v29 = vor.u32 %v3158_v40, %v3029_v11  ;;  %v2978_v11 = vor.u32 %v3143_v58, %v2975_v39  ;;  %v2981_v40 = vld [vmem:[#allocation11 + $0x48] sm:$0xf] }
 0x265   : > { %1683 = vst [vmem:[%s4899_s27] sm:$0xff] %v1595_v17  ;;  %2166 = vmatpush.bf16.msra.mxu1 %v3030_v29  ;;  %v3146_v29 = vld [vmem:[#allocation11 + $0x54] sm:$0xf0]  ;;  %2120 = vmatpush.bf16.msra.mxu0 %v2978_v11 }
 0x266   : > { %1684 = vst [vmem:[%s4899_s27 + $0x8] sm:$0xff] %v1644_v51 }
 0x26a   : > { %v1596_v48 = vpop.f32.mrf.mxu0  ;;  %v1645_v41 = vpop.f32.mrf.mxu1 }
 0x26b   : > { %v1597_v46 = vadd.f32 %v1596_v48, %v4893_v61  ;;  %v1646_v15 = vadd.f32 %v1645_v41, %v4895_v53  ;;  %v3018_v48 = vor.u32 %v3152_v5, %v3015_v54  ;;  %v3139_v5 = vld [vmem:[#allocation11 + $0x24] sm:$0xf]  ;;  %v2959_v54 = vld [vmem:[#allocation11 + $0x30] sm:$0xf0] }
 0x26d   : > { %1685 = vst [vmem:[%s4899_s27 + $0x10] sm:$0xff] %v1597_v46  ;;  %v1715_v16 = vpack.c.bf16 %v1597_v46, %v1595_v17  ;;  %2216 = vmatpush.bf16.msra.mxu2 %v3018_v48  ;;  %v2965_v48 = vld [vmem:[#allocation11 + $0x28] sm:$0xf] }
 0x26e   : > { %1686 = vst [vmem:[%s4899_s27 + $0x18] sm:$0xff] %v1646_v15 }
 0x26f   : > { %1799 = vmatmul.bf16.vlgmr.msrb.gmra.mxu2 %v1715_v16 }
 0x272   : > { %v1599_v57 = vpop.f32.mrf.mxu0  ;;  %v1648_v28 = vpop.f32.mrf.mxu1 }
 0x273   : > { %v1600_v19 = vadd.f32 %v1599_v57, %v4893_v61  ;;  %v1649_v25 = vadd.f32 %v1648_v28, %v4895_v53  ;;  %v3014_v57 = vor.u32 %v3154_v1, %v3013_v26 }
 0x275   : > { %1687 = vst [vmem:[%s4899_s27 + $0x20] sm:$0xff] %v1600_v19  ;;  %2167 = vmatpush.bf16.msra.mxu1 %v3014_v57 }
 0x276   : > { %1688 = vst [vmem:[%s4899_s27 + $0x28] sm:$0xff] %v1649_v25 }
 0x27a   : > { %v1601_v62 = vpop.f32.mrf.mxu0  ;;  %v1650_v9 = vpop.f32.mrf.mxu1 }
 0x27b   : > { %v1602_v33 = vadd.f32 %v1601_v62, %v4893_v61  ;;  %v1651_v37 = vadd.f32 %v1650_v9, %v4895_v53  ;;  %v3002_v62 = vor.u32 %v3148_v50, %v2999_v18  ;;  %v2942_v50 = vor.u32 %v3137_v55, %v2941_v31  ;;  %v3136_v18 = vld [vmem:[#allocation11 + $0xc] sm:$0xf]  ;;  %v2269_v55 = vld [vmem:[%s4967_s4 + $0x38] sm:$0xff] }
 0x27d   : > { %1689 = vst [vmem:[%s4899_s27 + $0x30] sm:$0xff] %v1602_v33  ;;  %v1716_v63 = vpack.c.bf16 %v1602_v33, %v1600_v19  ;;  %2217 = vmatpush.bf16.msra.mxu2 %v3002_v62  ;;  %v2951_v62 = vld [vmem:[#allocation11 + $0x18] sm:$0xf0] }
 0x27e   : > { %1690 = vst [vmem:[%s4899_s27 + $0x38] sm:$0xff] %v1651_v37 }
 0x27f   : > { %1804 = vmatmul.bf16.gmra.mxu2 %v1716_v63 }
 0x282   : > { %v1604_v59 = vpop.f32.mrf.mxu0  ;;  %v1653_v13 = vpop.f32.mrf.mxu1 }
 0x283   : > { %v1605_v38 = vadd.f32 %v1604_v59, %v4893_v61  ;;  %v1654_v2 = vadd.f32 %v1653_v13, %v4895_v53  ;;  %v2998_v59 = vor.u32 %v3150_v43, %v2997_v24  ;;  %v2949_v24 = vld [vmem:[#allocation11 + $0x8] sm:$0xf]  ;;  %v2946_v43 = vor.u32 %v3135_v22, %v2943_v7  ;;  %v2272_v22 = vld [vmem:[%s4967_s4 + $0x50] sm:$0xff]  ;;  %v2277_v7 = vld [vmem:[%s4967_s4 + $0x78] sm:$0xff] }
 0x285   : > { %1691 = vst [vmem:[%s4899_s27 + $0x40] sm:$0xff] %v1605_v38  ;;  %2168 = vmatpush.bf16.msra.mxu1 %v2998_v59  ;;  %v3138_v59 = vld [vmem:[#allocation11 + $0x14] sm:$0xf0] }
 0x286   : > { %1692 = vst [vmem:[%s4899_s27 + $0x48] sm:$0xff] %v1654_v2 }
 0x28a   : > { %v1606_v36 = vpop.f32.mrf.mxu0  ;;  %v1655_v0 = vpop.f32.mrf.mxu1 }
 0x28b   : > { %v1607_v10 = vadd.f32 %v1606_v36, %v4893_v61  ;;  %v1656_v12 = vadd.f32 %v1655_v0, %v4895_v53  ;;  %v2986_v36 = vor.u32 %v3144_v42, %v2983_v45 }
 0x28d   : > { %1693 = vst [vmem:[%s4899_s27 + $0x50] sm:$0xff] %v1607_v10  ;;  %v1717_v23 = vpack.c.bf16 %v1607_v10, %v1605_v38  ;;  %2218 = vmatpush.bf16.msra.mxu2 %v2986_v36 }
 0x28e   : > { %1694 = vst [vmem:[%s4899_s27 + $0x58] sm:$0xff] %v1656_v12 }
 0x28f   : > { %1809 = vmatmul.bf16.gmra.mxu2 %v1717_v23 }
 0x292   : > { %v1609_v32 = vpop.f32.mrf.mxu0  ;;  %v1658_v17 = vpop.f32.mrf.mxu1 }
 0x293   : > { %v1610_v51 = vadd.f32 %v1609_v32, %v4893_v61  ;;  %v1659_v52 = vadd.f32 %v1658_v17, %v4895_v53  ;;  %v2957_v32 = vld [vmem:[#allocation11 + $0x20] sm:$0xf]  ;;  %v2982_v17 = vor.u32 %v3146_v29, %v2981_v40  ;;  %v2263_v40 = vld [vmem:[%s4967_s4 + $0x8] sm:$0xff] }
 0x294   : > { %v2266_v29 = vld [vmem:[%s4967_s4 + $0x20] sm:$0xff] }
 0x295   : > { %1695 = vst [vmem:[%s4899_s27 + $0x60] sm:$0xff] %v1610_v51  ;;  %2169 = vmatpush.bf16.msra.mxu1 %v2982_v17 }
 0x296   : > { %1696 = vst [vmem:[%s4899_s27 + $0x68] sm:$0xff] %v1659_v52  ;;  %v3140_v52 = vld [vmem:[#allocation11 + $0x2c] sm:$0xf] }
 0x297   : > { %v2970_v56 = vor.u32 %v3140_v52, %v2967_v14 }
 0x299   : > { %2219 = vmatpush.bf16.msra.mxu2 %v2970_v56 }
 0x29a   : > { %v1611_v41 = vpop.f32.mrf.mxu0  ;;  %v1660_v46 = vpop.f32.mrf.mxu1 }
 0x29b   : > { %v1612_v15 = vadd.f32 %v1611_v41, %v4893_v61  ;;  %v1661_v16 = vadd.f32 %v1660_v46, %v4895_v53 }
 0x29d   : > { %1697 = vst [vmem:[%s4899_s27 + $0x70] sm:$0xff] %v1612_v15  ;;  %v1718_v44 = vpack.c.bf16 %v1612_v15, %v1610_v51  ;;  %v3141_v51 = vld [vmem:[#allocation11 + $0x2c] sm:$0xf0]  ;;  %v2962_v15 = vor.u32 %v3139_v5, %v2959_v54  ;;  %v2265_v5 = vld [vmem:[%s4967_s4 + $0x18] sm:$0xff] }
 0x29e   : > { %1698 = vst [vmem:[%s4899_s27 + $0x78] sm:$0xff] %v1661_v16  ;;  %v2958_v27 = vor.u32 %v3141_v51, %v2957_v32  ;;  %v3142_v16 = vld [vmem:[#allocation11 + $0x34] sm:$0xf0]  ;;  %v2268_v54 = vld [vmem:[%s4967_s4 + $0x30] sm:$0xff] }
 0x29f   : > { %1814 = vmatmul.bf16.gmra.mxu2 %v1718_v44  ;;  %v2966_v49 = vor.u32 %v3142_v16, %v2965_v48  ;;  %2121 = vmatpush.bf16.msra.mxu0 %v2962_v15 }
 0x2a0   : > { %2072 = vmatpush.bf16.msra.mxu3 %v2958_v27 }
 0x2a1   : > { %2170 = vmatpush.bf16.msra.mxu1 %v2966_v49  ;;  %v2267_v49 = vld [vmem:[%s4967_s4 + $0x28] sm:$0xff] }
 0x2a2   : > { %v1614_v28 = vpop.f32.mrf.mxu0  ;;  %v1663_v19 = vpop.f32.mrf.mxu1 }
 0x2a3   : > { %v1615_v25 = vadd.f32 %v1614_v28, %v4893_v61  ;;  %v1664_v8 = vadd.f32 %v1663_v19, %v4895_v53  ;;  %2122 = vmatpush.bf16.msra.mxu0 %v2946_v43 }
 0x2a4   : > { %2073 = vmatpush.bf16.msra.mxu3 %v2942_v50  ;;  %v2276_v50 = vld [vmem:[%s4967_s4 + $0x70] sm:$0xff] }
 0x2a5   : > { %1699 = vst [vmem:[%s4899_s27 + $0x80] sm:$0xff] %v1615_v25 }
 0x2a6   : > { %1700 = vst [vmem:[%s4899_s27 + $0x88] sm:$0xff] %v1664_v8 }
 0x2aa   : > { %v1616_v9 = vpop.f32.mrf.mxu0  ;;  %v1665_v33 = vpop.f32.mrf.mxu1 }
 0x2ab   : > { %v1617_v37 = vadd.f32 %v1616_v9, %v4893_v61  ;;  %v1666_v63 = vadd.f32 %v1665_v33, %v4895_v53  ;;  %v2954_v9 = vor.u32 %v3136_v18, %v2951_v62 }
 0x2ad   : > { %1701 = vst [vmem:[%s4899_s27 + $0x90] sm:$0xff] %v1617_v37  ;;  %v1719_v60 = vpack.c.bf16 %v1617_v37, %v1615_v25  ;;  %2220 = vmatpush.bf16.msra.mxu2 %v2954_v9 }
 0x2ae   : > { %1702 = vst [vmem:[%s4899_s27 + $0x98] sm:$0xff] %v1666_v63 }
 0x2af   : > { %1819 = vmatmul.bf16.gmra.mxu2 %v1719_v60 }
 0x2b2   : > { %v1619_v13 = vpop.f32.mrf.mxu0  ;;  %v1668_v38 = vpop.f32.mrf.mxu1 }
 0x2b3   : > { %v1620_v2 = vadd.f32 %v1619_v13, %v4893_v61  ;;  %v1669_v30 = vadd.f32 %v1668_v38, %v4895_v53  ;;  %v2950_v13 = vor.u32 %v3138_v59, %v2949_v24  ;;  %v3716_v38 = vmov 0  }
 0x2b4   : > { %3310 = vset.pattern.permute.xlu1 %v3716_v38  ;;  %3312 = vset.pattern.permute.xlu0 %v3716_v38 }
 0x2b5   : > { %1703 = vst [vmem:[%s4899_s27 + $0xa0] sm:$0xff] %v1620_v2  ;;  %2171 = vmatpush.bf16.msra.mxu1 %v2950_v13  ;;  %3311 = vset.pattern.permute.xlu2 %v3716_v38  ;;  %v2275_v13 = vld [vmem:[%s4967_s4 + $0x68] sm:$0xff] }
 0x2b6   : > { %1704 = vst [vmem:[%s4899_s27 + $0xa8] sm:$0xff] %v1669_v30  ;;  %2285 = vperm.xlu2 %3311, %v2263_v40  }
 0x2ba   : > { %v1621_v0 = vpop.f32.mrf.mxu0  ;;  %v1670_v10 = vpop.f32.mrf.mxu1 }
 0x2bb   : > { %v1622_v12 = vadd.f32 %v1621_v0, %v4893_v61  ;;  %v1671_v23 = vadd.f32 %v1670_v10, %v4895_v53  ;;  %v2264_v0 = vld [vmem:[%s4967_s4 + $0x10] sm:$0xff] }
 0x2bc   : > { %2290 = vperm.xlu0 %3312, %v2264_v0   ;;  %v1896_v0 = vld [vmem:[%s5211_s9] sm:$0xf] }
 0x2bd   : > { %1705 = vst [vmem:[%s4899_s27 + $0xb0] sm:$0xff] %v1622_v12  ;;  %v1720_v21 = vpack.c.bf16 %v1622_v12, %v1620_v2  ;;  %v2262_v2 = vld [vmem:[%s4967_s4] sm:$0xff]  ;;  %v5015_v40 = vperm.slane %v1896_v0, 0 }
 0x2be   : > { %1706 = vst [vmem:[%s4899_s27 + $0xb8] sm:$0xff] %v1671_v23  ;;  %2280 = vperm.xlu1 %3310, %v2262_v2   ;;  %2295 = vperm.xlu2 %3311, %v2265_v5  }
 0x2bf   : > { %1824 = vmatmul.bf16.gmra.mxu2 %v1720_v21 }
 0x2c2   : > { %v1624_v41 = vpop.f32.mrf.mxu0  ;;  %v1673_v46 = vpop.f32.mrf.mxu1 }
 0x2c3   : > { %v1625_v44 = vadd.f32 %v1624_v41, %v4893_v61  ;;  %v1674_v20 = vadd.f32 %v1673_v46, %v4895_v53 }
 0x2c5   : > { %1707 = vst [vmem:[%s4899_s27 + $0xc0] sm:$0xff] %v1625_v44 }
 0x2c6   : > { %1708 = vst [vmem:[%s4899_s27 + $0xc8] sm:$0xff] %v1674_v20  ;;  %2300 = vperm.xlu1 %3310, %v2266_v29   ;;  %2305 = vperm.xlu2 %3311, %v2267_v49  }
 0x2ca   : > { %v1626_v4 = vpop.f32.mrf.mxu0  ;;  %v1675_v26 = vpop.f32.mrf.mxu1 }
 0x2cb   : > { %v1627_v1 = vadd.f32 %v1626_v4, %v4893_v61  ;;  %v1676_v57 = vadd.f32 %v1675_v26, %v4895_v53  ;;  %v2270_v4 = vld [vmem:[%s4967_s4 + $0x40] sm:$0xff] }
 0x2cd   : > { %1709 = vst [vmem:[%s4899_s27 + $0xd0] sm:$0xff] %v1627_v1  ;;  %v1721_v28 = vpack.c.bf16 %v1627_v1, %v1625_v44 }
 0x2ce   : > { %1710 = vst [vmem:[%s4899_s27 + $0xd8] sm:$0xff] %v1676_v57  ;;  %2310 = vperm.xlu1 %3310, %v2268_v54   ;;  %2315 = vperm.xlu2 %3311, %v2269_v55  }
 0x2cf   : > { %1829 = vmatmul.bf16.gmra.mxu2 %v1721_v28  ;;  %v2271_v28 = vld [vmem:[%s4967_s4 + $0x48] sm:$0xff] }
 0x2d0   : > { %2325 = vperm.xlu0 %3312, %v2271_v28  }
 0x2d2   : > { %v1629_v19 = vpop.f32.mrf.mxu0  ;;  %v1678_v25 = vpop.f32.mrf.mxu1 }
 0x2d3   : > { %v1630_v8 = vadd.f32 %v1629_v19, %v4893_v61  ;;  %v1679_v35 = vadd.f32 %v1678_v25, %v4895_v53  ;;  %v2273_v19 = vld [vmem:[%s4967_s4 + $0x58] sm:$0xff] }
 0x2d5   : > { %1711 = vst [vmem:[%s4899_s27 + $0xe0] sm:$0xff] %v1630_v8 }
 0x2d6   : > { %1712 = vst [vmem:[%s4899_s27 + $0xe8] sm:$0xff] %v1679_v35  ;;  %2320 = vperm.xlu1 %3310, %v2270_v4   ;;  %2330 = vperm.xlu2 %3311, %v2272_v22  }
 0x2da   : > { %v1631_v33 = vpop.f32.mrf.mxu0  ;;  %v1680_v37 = vpop.f32.mrf.mxu1 }
 0x2db   : > { %v1632_v63 = vadd.f32 %v1631_v33, %v4893_v61  ;;  %v1681_v60 = vadd.f32 %v1680_v37, %v4895_v53  ;;  %v4972_v53 = vld [vmem:[%s5209_s7] ss:$0 sm:$0xff] }
 0x2dc   : > { %v2274_v33 = vld [vmem:[%s4967_s4 + $0x60] sm:$0xff] }
 0x2dd   : > { %1713 = vst [vmem:[%s4899_s27 + $0xf0] sm:$0xff] %v1632_v63  ;;  %v1722_v47 = vpack.c.bf16 %v1632_v63, %v1630_v8  ;;  %2340 = vperm.xlu0 %3312, %v2274_v33  }
 0x2de   : > { %1714 = vst [vmem:[%s4899_s27 + $0xf8] sm:$0xff] %v1681_v60  ;;  %2335 = vperm.xlu1 %3310, %v2273_v19   ;;  %2345 = vperm.xlu2 %3311, %v2275_v13   ;;  %s2492_s27 = scalar_lea.sflag [#allocation15], %s3904_s15 }
 0x2df   : > { %1834 = vmatmul.bf16.gmra.mxu2 %v1722_v47 }
 0x2e5   : > { %2355 = vperm.xlu0 %3312, %v2277_v7  }
 0x2e6   : > { %2350 = vperm.xlu1 %3310, %v2276_v50  }
 0x2f2   : > { %v1800_v61 = vpop.f32.mrf.mxu2 }
 0x2f3   : > { %v1801_v30 = vadd.f32 %v4972_v53, %v1800_v61 }
 0x2f5   : > { %3379 = vtanh.f32 %v1801_v30 }
 0x2fa   : > { %v1802_v34 = vpop.f32.mrf.mxu2 }
 0x2fb   : > { %v1803_v3 = vadd.f32 %v4972_v53, %v1802_v34  ;;  %v3380_v6 = vpop.eup %3379 }
 0x2fd   : > { %3381 = vtanh.f32 %v1803_v3 }
 0x302   : > { %v1805_v42 = vpop.f32.mrf.mxu2 }
 0x303   : > { %v3382_v45 = vpop.eup %3381  ;;  %v1806_v10 = vadd.f32 %v4972_v53, %v1805_v42 }
 0x304   : > { %v1856_v36 = vpack.c.bf16 %v3382_v45, %v3380_v6 }
 0x305   : > { %3383 = vtanh.f32 %v1806_v10  ;;  %v5009_v10 = vperm.slane %v1896_v0, 1 }
 0x306   : > { %2074 = vmatmul.bf16.vlgmr.msra.gmra.mxu3 %v1856_v36  ;;  %2123 = vmatmul.bf16.vlgmr.msra.gmra.mxu0 %v1856_v36 }
 0x307   : > { %2172 = vmatmul.bf16.vlgmr.msra.gmra.mxu1 %v1856_v36  ;;  %2221 = vmatmul.bf16.vlgmr.msra.gmra.mxu2 %v1856_v36 }
 0x30a   : > { %v1807_v12 = vpop.f32.mrf.mxu2 }
 0x30b   : > { %v1808_v23 = vadd.f32 %v4972_v53, %v1807_v12  ;;  %v3384_v21 = vpop.eup %3383  ;;  %v5011_v12 = vperm.slane %v1896_v0, 2 }
 0x30d   : > { %3385 = vtanh.f32 %v1808_v23 }
 0x312   : > { %v1810_v58 = vpop.f32.mrf.mxu2 }
 0x313   : > { %v3386_v39 = vpop.eup %3385  ;;  %v1811_v32 = vadd.f32 %v4972_v53, %v1810_v58 }
 0x314   : > { %v1857_v11 = vpack.c.bf16 %v3386_v39, %v3384_v21 }
 0x315   : > { %3387 = vtanh.f32 %v1811_v32  ;;  %v5017_v32 = vperm.slane %v1896_v0, 3 }
 0x316   : > { %2079 = vmatmul.bf16.gmra.mxu3 %v1857_v11  ;;  %2128 = vmatmul.bf16.gmra.mxu0 %v1857_v11 }
 0x317   : > { %2177 = vmatmul.bf16.gmra.mxu1 %v1857_v11  ;;  %2226 = vmatmul.bf16.gmra.mxu2 %v1857_v11 }
 0x31a   : > { %v1812_v17 = vpop.f32.mrf.mxu2 }
 0x31b   : > { %v1813_v51 = vadd.f32 %v4972_v53, %v1812_v17  ;;  %v3388_v52 = vpop.eup %3387 }
 0x31d   : > { %3389 = vtanh.f32 %v1813_v51 }
 0x322   : > { %v1815_v14 = vpop.f32.mrf.mxu2 }
 0x323   : > { %v3390_v27 = vpop.eup %3389  ;;  %v1816_v48 = vadd.f32 %v4972_v53, %v1815_v14 }
 0x324   : > { %v1858_v56 = vpack.c.bf16 %v3390_v27, %v3388_v52 }
 0x325   : > { %3391 = vtanh.f32 %v1816_v48 }
 0x326   : > { %2084 = vmatmul.bf16.gmra.mxu3 %v1858_v56  ;;  %2133 = vmatmul.bf16.gmra.mxu0 %v1858_v56 }
 0x327   : > { %2182 = vmatmul.bf16.gmra.mxu1 %v1858_v56  ;;  %2231 = vmatmul.bf16.gmra.mxu2 %v1858_v56  ;;  %v2286_v56 = vpop.permute.xlu2 %2285 }
 0x32a   : > { %v1817_v41 = vpop.f32.mrf.mxu2 }
 0x32b   : > { %v1818_v46 = vadd.f32 %v4972_v53, %v1817_v41  ;;  %v3392_v15 = vpop.eup %3391 }
 0x32d   : > { %3393 = vtanh.f32 %v1818_v46 }
 0x332   : > { %v1820_v16 = vpop.f32.mrf.mxu2 }
 0x333   : > { %v3394_v44 = vpop.eup %3393  ;;  %v1821_v26 = vadd.f32 %v4972_v53, %v1820_v16 }
 0x334   : > { %v1859_v20 = vpack.c.bf16 %v3394_v44, %v3392_v15 }
 0x335   : > { %3395 = vtanh.f32 %v1821_v26 }
 0x336   : > { %2089 = vmatmul.bf16.gmra.mxu3 %v1859_v20  ;;  %2138 = vmatmul.bf16.gmra.mxu0 %v1859_v20 }
 0x337   : > { %2187 = vmatmul.bf16.gmra.mxu1 %v1859_v20  ;;  %2236 = vmatmul.bf16.gmra.mxu2 %v1859_v20 }
 0x33a   : > { %v1822_v1 = vpop.f32.mrf.mxu2 }
 0x33b   : > { %v1823_v57 = vadd.f32 %v4972_v53, %v1822_v1  ;;  %v3396_v25 = vpop.eup %3395 }
 0x33d   : > { %3397 = vtanh.f32 %v1823_v57 }
 0x342   : > { %v1825_v8 = vpop.f32.mrf.mxu2 }
 0x343   : > { %v3398_v35 = vpop.eup %3397  ;;  %v1826_v18 = vadd.f32 %v4972_v53, %v1825_v8 }
 0x344   : > { %v1860_v31 = vpack.c.bf16 %v3398_v35, %v3396_v25 }
 0x345   : > { %3399 = vtanh.f32 %v1826_v18 }
 0x346   : > { %2094 = vmatmul.bf16.gmra.mxu3 %v1860_v31  ;;  %2143 = vmatmul.bf16.gmra.mxu0 %v1860_v31 }
 0x347   : > { %2192 = vmatmul.bf16.gmra.mxu1 %v1860_v31  ;;  %2241 = vmatmul.bf16.gmra.mxu2 %v1860_v31 }
 0x34a   : > { %v1827_v62 = vpop.f32.mrf.mxu2 }
 0x34b   : > { %v1828_v9 = vadd.f32 %v4972_v53, %v1827_v62  ;;  %v3400_v37 = vpop.eup %3399 }
 0x34d   : > { %3401 = vtanh.f32 %v1828_v9 }
 0x352   : > { %v1830_v63 = vpop.f32.mrf.mxu2 }
 0x353   : > { %v3402_v60 = vpop.eup %3401  ;;  %v1831_v24 = vadd.f32 %v4972_v53, %v1830_v63 }
 0x354   : > { %v1861_v47 = vpack.c.bf16 %v3402_v60, %v3400_v37 }
 0x355   : > { %3403 = vtanh.f32 %v1831_v24 }
 0x356   : > { %2099 = vmatmul.bf16.gmra.mxu3 %v1861_v47  ;;  %2148 = vmatmul.bf16.gmra.mxu0 %v1861_v47 }
 0x357   : > { %2197 = vmatmul.bf16.gmra.mxu1 %v1861_v47  ;;  %2246 = vmatmul.bf16.gmra.mxu2 %v1861_v47 }
 0x35a   : > { %v1832_v43 = vpop.f32.mrf.mxu2 }
 0x35b   : > { %v1833_v59 = vadd.f32 %v4972_v53, %v1832_v43  ;;  %v3404_v38 = vpop.eup %3403 }
 0x35d   : > { %3405 = vtanh.f32 %v1833_v59 }
 0x362   : > { %v1835_v61 = vpop.f32.mrf.mxu2 }
 0x363   : > { %v3406_v2 = vpop.eup %3405  ;;  %v1836_v34 = vadd.f32 %v4972_v53, %v1835_v61 }
 0x364   : > { %v1862_v30 = vpack.c.bf16 %v3406_v2, %v3404_v38 }
 0x365   : > { %3407 = vtanh.f32 %v1836_v34 }
 0x366   : > { %2104 = vmatmul.bf16.gmra.mxu3 %v1862_v30  ;;  %2153 = vmatmul.bf16.gmra.mxu0 %v1862_v30 }
 0x367   : > { %2202 = vmatmul.bf16.gmra.mxu1 %v1862_v30  ;;  %2251 = vmatmul.bf16.gmra.mxu2 %v1862_v30 }
 0x36a   : > { %v1837_v3 = vpop.f32.mrf.mxu2 }
 0x36b   : > { %v1838_v6 = vadd.f32 %v4972_v53, %v1837_v3  ;;  %v3408_v42 = vpop.eup %3407  ;;  %v2281_v53 = vpop.permute.xlu1 %2280 }
 0x36d   : > { %3409 = vtanh.f32 %v1838_v6 }
 0x373   : > { %v3410_v45 = vpop.eup %3409 }
 0x374   : > { %v1863_v36 = vpack.c.bf16 %v3410_v45, %v3408_v42 }
 0x376   : > { %2109 = vmatmul.bf16.gmra.mxu3 %v1863_v36  ;;  %2158 = vmatmul.bf16.gmra.mxu0 %v1863_v36 }
 0x377   : > { %2207 = vmatmul.bf16.gmra.mxu1 %v1863_v36  ;;  %2256 = vmatmul.bf16.gmra.mxu2 %v1863_v36 }
 0x383   : > { %v2124_v23 = vpop.f32.mrf.mxu0 }
 0x384   : > { %v2125_v21 = vadd.f32 %v2124_v23, %v5009_v10  ;;  %v2173_v58 = vpop.f32.mrf.mxu1 }
 0x385   : > { %v2174_v39 = vadd.f32 %v2173_v58, %v5011_v12 }
 0x386   : > { %v2359_v11 = vadd.f32 %v2281_v53, %v2125_v21 }
 0x387   : > { %v2360_v29 = vadd.f32 %v2281_v53, %v2174_v39 }
 0x388   : > { %2423 = vst [vmem:[%s5021_s3 + $0x8] sm:$0xff] %v2359_v11 }
 0x389   : > { %2424 = vst [vmem:[%s5021_s3 + $0x10] sm:$0xff] %v2360_v29  ;;  %v2075_v17 = vpop.f32.mrf.mxu3 }
 0x38a   : > { %v2076_v51 = vadd.f32 %v2075_v17, %v5015_v40  ;;  %v2222_v52 = vpop.f32.mrf.mxu2 }
 0x38b   : > { %v2223_v14 = vadd.f32 %v2222_v52, %v5017_v32  ;;  %v2126_v27 = vpop.f32.mrf.mxu0 }
 0x38c   : > { %v2358_v5 = vadd.f32 %v2281_v53, %v2076_v51  ;;  %v2127_v54 = vadd.f32 %v2126_v27, %v5009_v10  ;;  %v2175_v48 = vpop.f32.mrf.mxu1 }
 0x38d   : > { %v2361_v41 = vadd.f32 %v2281_v53, %v2223_v14  ;;  %v2176_v46 = vadd.f32 %v2175_v48, %v5011_v12 }
 0x38e   : > { %2422 = vst [vmem:[%s5021_s3] sm:$0xff] %v2358_v5  ;;  %v2363_v15 = vadd.f32 %v2286_v56, %v2127_v54 }
 0x38f   : > { %2425 = vst [vmem:[%s5021_s3 + $0x18] sm:$0xff] %v2361_v41  ;;  %v2364_v16 = vadd.f32 %v2286_v56, %v2176_v46 }
 0x390   : > { %2427 = vst [vmem:[%s5021_s3 + $0x28] sm:$0xff] %v2363_v15 }
 0x391   : > { %2428 = vst [vmem:[%s5021_s3 + $0x30] sm:$0xff] %v2364_v16  ;;  %v2077_v44 = vpop.f32.mrf.mxu3 }
 0x392   : > { %v2078_v20 = vadd.f32 %v2077_v44, %v5015_v40  ;;  %v2224_v49 = vpop.f32.mrf.mxu2 }
 0x393   : > { %3618 = shalt.err (!%p3615_p10)
}
 0x394   : > { %s3717_s8 = smov 256   ;;  %s3718_s22 = smov 16   ;;  %v2225_v4 = vadd.f32 %v2224_v49, %v5017_v32  ;;  %v2129_v26 = vpop.f32.mrf.mxu0  ;;  %v2291_v1 = vpop.permute.xlu0 %2290  ;;  %v2362_v57 = vadd.f32 %v2286_v56, %v2078_v20 }
 0x395   : > { %3218 = dma.vmem_to_hbm [thread:$0]  (%p3871_p0), %s5034_s5, 4096, %s2526_s28, %s2492_s27, %s3717_s8, %s3717_s8, %s3718_s22   ;;  %v2130_v28 = vadd.f32 %v2129_v26, %v5009_v10  ;;  %v2178_v19 = vpop.f32.mrf.mxu1  ;;  %v2296_v33 = vpop.permute.xlu2 %2295 }
 0x396   : > { %v2365_v25 = vadd.f32 %v2286_v56, %v2225_v4  ;;  %v2179_v8 = vadd.f32 %v2178_v19, %v5011_v12  ;;  %2426 = vst [vmem:[%s5021_s3 + $0x20] sm:$0xff] %v2362_v57  ;;  %v2301_v2 = vpop.permute.xlu1 %2300  ;;  %s3168_s5 = sshll.u32 %s3805_s24, 9  ;;  %s2505_s24 = sshll.u32 %s5021_s3, 4  ;;  %s2506_s24 = int_to_ptr.vmem [resolvable:$true] %s2505_s24 }
 0x397   : > { %v2367_v35 = vadd.f32 %v2291_v1, %v2130_v28  ;;  %s2504_s28 = scalar_lea.hbm %s5212_s10, %s3168_s5  ;;  %s2487_s23 = scalar_lea.sflag [#allocation4], %s3904_s15 }
 0x398   : > { %2429 = vst [vmem:[%s5021_s3 + $0x38] sm:$0xff] %v2365_v25  ;;  %v2368_v31 = vadd.f32 %v2291_v1, %v2179_v8  ;;  %s2507_s27 = sshll.u32 %s2504_s28, 4  ;;  %s3639_s12 = scalar_lea.hbm %s5212_s10, 1024  ;;  %s2508_s27 = int_to_ptr.hbm [resolvable:$true] %s2507_s27 }
 0x399   : > { %2431 = vst [vmem:[%s5021_s3 + $0x48] sm:$0xff] %v2367_v35  ;;  %v2080_v55 = vpop.f32.mrf.mxu3  ;;  %s3633_s21 = sshra.s32 %s2508_s27, 4  ;;  %s3634_s21 = int_to_ptr.hbm [resolvable:$true] %s3633_s21 }
 0x39a   : > { %2432 = vst [vmem:[%s5021_s3 + $0x50] sm:$0xff] %v2368_v31  ;;  %v2081_v50 = vadd.f32 %v2080_v55, %v5015_v40  ;;  %v2227_v18 = vpop.f32.mrf.mxu2  ;;  %s3635_s4 = scalar_lea.hbm %s3634_s21, 512  ;;  %p3640_p5 = scmp.lt.s32.totalorder %s3634_s21, %s5212_s10 }
 0x39b   : > { %v2228_v62 = vadd.f32 %v2227_v18, %v5017_v32  ;;  %p3636_p11 = scmp.ne.s32.totalorder %s3634_s21, %s3635_s4  ;;  %p3641_p1 = scmp.lt.s32.totalorder %s3639_s12, %s3635_s4 }
 0x39c   : > { %v2131_v9 = vpop.f32.mrf.mxu0  ;;  %v2366_v37 = vadd.f32 %v2291_v1, %v2081_v50 }
 0x39d   : > { %v2132_v63 = vadd.f32 %v2131_v9, %v5009_v10  ;;  %v2180_v60 = vpop.f32.mrf.mxu1  ;;  %v2369_v47 = vadd.f32 %v2291_v1, %v2228_v62  ;;  %v2306_v39 = vpop.permute.xlu2 %2305  ;;  %p3637_p12 = pnand %p3636_p11, %p3871_p0  ;;  %p3642_p3 = por %p3641_p1, %p3640_p5 }
 0x39e   : > { %v2181_v22 = vadd.f32 %v2180_v60, %v5011_v12  ;;  %2430 = vst [vmem:[%s5021_s3 + $0x40] sm:$0xff] %v2366_v37  ;;  %v2311_v46 = vpop.permute.xlu1 %2310 }
 0x39f   : > { %v2371_v7 = vadd.f32 %v2296_v33, %v2132_v63  ;;  %2433 = vst [vmem:[%s5021_s3 + $0x58] sm:$0xff] %v2369_v47  ;;  %p3638_p2 = pneg %p3637_p12 }
 0x3a0   : > { %v2372_v24 = vadd.f32 %v2296_v33, %v2181_v22 }
 0x3a1   : > { %2435 = vst [vmem:[%s5021_s3 + $0x68] sm:$0xff] %v2371_v7  ;;  %v2082_v43 = vpop.f32.mrf.mxu3  ;;  %p3643_p4 = pnand %p3642_p3, %p3638_p2 }
 0x3a2   : > { %2436 = vst [vmem:[%s5021_s3 + $0x70] sm:$0xff] %v2372_v24  ;;  %v2083_v59 = vadd.f32 %v2082_v43, %v5015_v40  ;;  %v2229_v13 = vpop.f32.mrf.mxu2 }
 0x3a3   : > { %v2230_v38 = vadd.f32 %v2229_v13, %v5017_v32 }
 0x3a4   : > { %v2134_v61 = vpop.f32.mrf.mxu0  ;;  %v2370_v30 = vadd.f32 %v2296_v33, %v2083_v59 }
 0x3a5   : > { %v2135_v34 = vadd.f32 %v2134_v61, %v5009_v10  ;;  %v2183_v3 = vpop.f32.mrf.mxu1  ;;  %v2373_v6 = vadd.f32 %v2296_v33, %v2230_v38  ;;  %v2316_v8 = vpop.permute.xlu2 %2315 }
 0x3a6   : > { %v2184_v42 = vadd.f32 %v2183_v3, %v5011_v12  ;;  %2434 = vst [vmem:[%s5021_s3 + $0x60] sm:$0xff] %v2370_v30  ;;  %v2321_v22 = vpop.permute.xlu1 %2320 }
 0x3a7   : > { %v2375_v45 = vadd.f32 %v2301_v2, %v2135_v34  ;;  %2437 = vst [vmem:[%s5021_s3 + $0x78] sm:$0xff] %v2373_v6 }
 0x3a8   : > { %v2376_v36 = vadd.f32 %v2301_v2, %v2184_v42  ;;  %v2326_v42 = vpop.permute.xlu0 %2325 }
 0x3a9   : > { %2439 = vst [vmem:[%s5021_s3 + $0x88] sm:$0xff] %v2375_v45  ;;  %v2085_v0 = vpop.f32.mrf.mxu3 }
 0x3aa   : > { %2440 = vst [vmem:[%s5021_s3 + $0x90] sm:$0xff] %v2376_v36  ;;  %v2086_v23 = vadd.f32 %v2085_v0, %v5015_v40  ;;  %v2232_v53 = vpop.f32.mrf.mxu2 }
 0x3ab   : > { %v2233_v21 = vadd.f32 %v2232_v53, %v5017_v32 }
 0x3ac   : > { %v2136_v58 = vpop.f32.mrf.mxu0  ;;  %v2374_v11 = vadd.f32 %v2301_v2, %v2086_v23 }
 0x3ad   : > { %v2137_v29 = vadd.f32 %v2136_v58, %v5009_v10  ;;  %v2185_v17 = vpop.f32.mrf.mxu1  ;;  %v2377_v51 = vadd.f32 %v2301_v2, %v2233_v21 }
 0x3ae   : > { %v2186_v52 = vadd.f32 %v2185_v17, %v5011_v12  ;;  %2438 = vst [vmem:[%s5021_s3 + $0x80] sm:$0xff] %v2374_v11 }
 0x3af   : > { %v2379_v14 = vadd.f32 %v2306_v39, %v2137_v29  ;;  %2441 = vst [vmem:[%s5021_s3 + $0x98] sm:$0xff] %v2377_v51 }
 0x3b0   : > { %v2380_v27 = vadd.f32 %v2306_v39, %v2186_v52 }
 0x3b1   : > { %2443 = vst [vmem:[%s5021_s3 + $0xa8] sm:$0xff] %v2379_v14  ;;  %v2087_v56 = vpop.f32.mrf.mxu3 }
 0x3b2   : > { %2444 = vst [vmem:[%s5021_s3 + $0xb0] sm:$0xff] %v2380_v27  ;;  %v2088_v5 = vadd.f32 %v2087_v56, %v5015_v40  ;;  %v2234_v54 = vpop.f32.mrf.mxu2 }
 0x3b3   : > { %v2235_v48 = vadd.f32 %v2234_v54, %v5017_v32 }
 0x3b4   : > { %v2139_v41 = vpop.f32.mrf.mxu0  ;;  %v2378_v15 = vadd.f32 %v2306_v39, %v2088_v5  ;;  %v2331_v5 = vpop.permute.xlu2 %2330 }
 0x3b5   : > { %v2140_v16 = vadd.f32 %v2139_v41, %v5009_v10  ;;  %v2188_v44 = vpop.f32.mrf.mxu1  ;;  %v2381_v20 = vadd.f32 %v2306_v39, %v2235_v48 }
 0x3b6   : > { %v2189_v49 = vadd.f32 %v2188_v44, %v5011_v12  ;;  %2442 = vst [vmem:[%s5021_s3 + $0xa0] sm:$0xff] %v2378_v15 }
 0x3b7   : > { %v2383_v4 = vadd.f32 %v2311_v46, %v2140_v16  ;;  %2445 = vst [vmem:[%s5021_s3 + $0xb8] sm:$0xff] %v2381_v20 }
 0x3b8   : > { %v2384_v26 = vadd.f32 %v2311_v46, %v2189_v49 }
 0x3b9   : > { %2447 = vst [vmem:[%s5021_s3 + $0xc8] sm:$0xff] %v2383_v4  ;;  %v2090_v1 = vpop.f32.mrf.mxu3 }
 0x3ba   : > { %2448 = vst [vmem:[%s5021_s3 + $0xd0] sm:$0xff] %v2384_v26  ;;  %v2091_v57 = vadd.f32 %v2090_v1, %v5015_v40  ;;  %v2237_v28 = vpop.f32.mrf.mxu2  ;;  %v2336_v1 = vpop.permute.xlu1 %2335 }
 0x3bb   : > { %v2238_v19 = vadd.f32 %v2237_v28, %v5017_v32 }
 0x3bc   : > { %v2141_v25 = vpop.f32.mrf.mxu0  ;;  %v2382_v35 = vadd.f32 %v2311_v46, %v2091_v57 }
 0x3bd   : > { %v2142_v31 = vadd.f32 %v2141_v25, %v5009_v10  ;;  %v2190_v55 = vpop.f32.mrf.mxu1  ;;  %v2385_v50 = vadd.f32 %v2311_v46, %v2238_v19 }
 0x3be   : > { %v2191_v18 = vadd.f32 %v2190_v55, %v5011_v12  ;;  %2446 = vst [vmem:[%s5021_s3 + $0xc0] sm:$0xff] %v2382_v35 }
 0x3bf   : > { %v2387_v62 = vadd.f32 %v2316_v8, %v2142_v31  ;;  %2449 = vst [vmem:[%s5021_s3 + $0xd8] sm:$0xff] %v2385_v50 }
 0x3c0   : > { %v2388_v9 = vadd.f32 %v2316_v8, %v2191_v18 }
 0x3c1   : > { %2451 = vst [vmem:[%s5021_s3 + $0xe8] sm:$0xff] %v2387_v62  ;;  %v2092_v33 = vpop.f32.mrf.mxu3 }
 0x3c2   : > { %2452 = vst [vmem:[%s5021_s3 + $0xf0] sm:$0xff] %v2388_v9  ;;  %v2093_v37 = vadd.f32 %v2092_v33, %v5015_v40  ;;  %v2239_v63 = vpop.f32.mrf.mxu2 }
 0x3c3   : > { %v2240_v60 = vadd.f32 %v2239_v63, %v5017_v32  ;;  %v2341_v63 = vpop.permute.xlu0 %2340 }
 0x3c4   : > { %v2144_v47 = vpop.f32.mrf.mxu0  ;;  %v2386_v7 = vadd.f32 %v2316_v8, %v2093_v37 }
 0x3c5   : > { %v2145_v24 = vadd.f32 %v2144_v47, %v5009_v10  ;;  %v2193_v43 = vpop.f32.mrf.mxu1  ;;  %v2389_v59 = vadd.f32 %v2316_v8, %v2240_v60 }
 0x3c6   : > { %v2194_v13 = vadd.f32 %v2193_v43, %v5011_v12  ;;  %2450 = vst [vmem:[%s5021_s3 + $0xe0] sm:$0xff] %v2386_v7 }
 0x3c7   : > { %v2391_v38 = vadd.f32 %v2321_v22, %v2145_v24  ;;  %2453 = vst [vmem:[%s5021_s3 + $0xf8] sm:$0xff] %v2389_v59 }
 0x3c8   : > { %v2392_v61 = vadd.f32 %v2321_v22, %v2194_v13 }
 0x3c9   : > { %2455 = vst [vmem:[%s5021_s3 + $0x108] sm:$0xff] %v2391_v38  ;;  %v2095_v2 = vpop.f32.mrf.mxu3 }
 0x3ca   : > { %2456 = vst [vmem:[%s5021_s3 + $0x110] sm:$0xff] %v2392_v61  ;;  %v2096_v30 = vadd.f32 %v2095_v2, %v5015_v40  ;;  %v2242_v34 = vpop.f32.mrf.mxu2  ;;  %v2346_v2 = vpop.permute.xlu2 %2345 }
 0x3cb   : > { %v2243_v3 = vadd.f32 %v2242_v34, %v5017_v32 }
 0x3cc   : > { %v2146_v6 = vpop.f32.mrf.mxu0  ;;  %v2390_v45 = vadd.f32 %v2321_v22, %v2096_v30 }
 0x3cd   : > { %v2147_v36 = vadd.f32 %v2146_v6, %v5009_v10  ;;  %v2195_v0 = vpop.f32.mrf.mxu1  ;;  %v2393_v23 = vadd.f32 %v2321_v22, %v2243_v3 }
 0x3ce   : > { %v2196_v53 = vadd.f32 %v2195_v0, %v5011_v12  ;;  %2454 = vst [vmem:[%s5021_s3 + $0x100] sm:$0xff] %v2390_v45 }
 0x3cf   : > { %v2395_v21 = vadd.f32 %v2326_v42, %v2147_v36  ;;  %2457 = vst [vmem:[%s5021_s3 + $0x118] sm:$0xff] %v2393_v23 }
 0x3d0   : > { %v2396_v58 = vadd.f32 %v2326_v42, %v2196_v53 }
 0x3d1   : > { %2459 = vst [vmem:[%s5021_s3 + $0x128] sm:$0xff] %v2395_v21  ;;  %v2097_v39 = vpop.f32.mrf.mxu3 }
 0x3d2   : > { %2460 = vst [vmem:[%s5021_s3 + $0x130] sm:$0xff] %v2396_v58  ;;  %v2098_v11 = vadd.f32 %v2097_v39, %v5015_v40  ;;  %v2244_v29 = vpop.f32.mrf.mxu2  ;;  %v2351_v39 = vpop.permute.xlu1 %2350 }
 0x3d3   : > { %v2245_v17 = vadd.f32 %v2244_v29, %v5017_v32 }
 0x3d4   : > { %v2149_v51 = vpop.f32.mrf.mxu0  ;;  %v2394_v52 = vadd.f32 %v2326_v42, %v2098_v11 }
 0x3d5   : > { %v2150_v14 = vadd.f32 %v2149_v51, %v5009_v10  ;;  %v2198_v27 = vpop.f32.mrf.mxu1  ;;  %v2397_v56 = vadd.f32 %v2326_v42, %v2245_v17 }
 0x3d6   : > { %v2199_v54 = vadd.f32 %v2198_v27, %v5011_v12  ;;  %2458 = vst [vmem:[%s5021_s3 + $0x120] sm:$0xff] %v2394_v52 }
 0x3d7   : > { %v2399_v48 = vadd.f32 %v2331_v5, %v2150_v14  ;;  %2461 = vst [vmem:[%s5021_s3 + $0x138] sm:$0xff] %v2397_v56 }
 0x3d8   : > { %v2400_v41 = vadd.f32 %v2331_v5, %v2199_v54 }
 0x3d9   : > { %2463 = vst [vmem:[%s5021_s3 + $0x148] sm:$0xff] %v2399_v48  ;;  %v2100_v46 = vpop.f32.mrf.mxu3 }
 0x3da   : > { %2464 = vst [vmem:[%s5021_s3 + $0x150] sm:$0xff] %v2400_v41  ;;  %v2101_v15 = vadd.f32 %v2100_v46, %v5015_v40  ;;  %v2247_v16 = vpop.f32.mrf.mxu2  ;;  %v2356_v46 = vpop.permute.xlu0 %2355 }
 0x3db   : > { %v2248_v44 = vadd.f32 %v2247_v16, %v5017_v32 }
 0x3dc   : > { %v2151_v20 = vpop.f32.mrf.mxu0  ;;  %v2398_v49 = vadd.f32 %v2331_v5, %v2101_v15 }
 0x3dd   : > { %v2152_v4 = vadd.f32 %v2151_v20, %v5009_v10  ;;  %v2200_v26 = vpop.f32.mrf.mxu1  ;;  %v2401_v57 = vadd.f32 %v2331_v5, %v2248_v44 }
 0x3de   : > { %v2201_v28 = vadd.f32 %v2200_v26, %v5011_v12  ;;  %2462 = vst [vmem:[%s5021_s3 + $0x140] sm:$0xff] %v2398_v49 }
 0x3df   : > { %v2403_v19 = vadd.f32 %v2336_v1, %v2152_v4  ;;  %2465 = vst [vmem:[%s5021_s3 + $0x158] sm:$0xff] %v2401_v57 }
 0x3e0   : > { %v2404_v25 = vadd.f32 %v2336_v1, %v2201_v28 }
 0x3e1   : > { %2467 = vst [vmem:[%s5021_s3 + $0x168] sm:$0xff] %v2403_v19  ;;  %v2102_v8 = vpop.f32.mrf.mxu3 }
 0x3e2   : > { %2468 = vst [vmem:[%s5021_s3 + $0x170] sm:$0xff] %v2404_v25  ;;  %v2103_v35 = vadd.f32 %v2102_v8, %v5015_v40  ;;  %v2249_v31 = vpop.f32.mrf.mxu2 }
 0x3e3   : > { %v2250_v55 = vadd.f32 %v2249_v31, %v5017_v32 }
 0x3e4   : > { %v2154_v50 = vpop.f32.mrf.mxu0  ;;  %v2402_v18 = vadd.f32 %v2336_v1, %v2103_v35 }
 0x3e5   : > { %v2155_v62 = vadd.f32 %v2154_v50, %v5009_v10  ;;  %v2203_v9 = vpop.f32.mrf.mxu1  ;;  %v2405_v33 = vadd.f32 %v2336_v1, %v2250_v55 }
 0x3e6   : > { %v2204_v37 = vadd.f32 %v2203_v9, %v5011_v12  ;;  %2466 = vst [vmem:[%s5021_s3 + $0x160] sm:$0xff] %v2402_v18 }
 0x3e7   : > { %v2407_v60 = vadd.f32 %v2341_v63, %v2155_v62  ;;  %2469 = vst [vmem:[%s5021_s3 + $0x178] sm:$0xff] %v2405_v33 }
 0x3e8   : > { %v2408_v47 = vadd.f32 %v2341_v63, %v2204_v37 }
 0x3e9   : > { %2471 = vst [vmem:[%s5021_s3 + $0x188] sm:$0xff] %v2407_v60  ;;  %v2105_v22 = vpop.f32.mrf.mxu3 }
 0x3ea   : > { %2472 = vst [vmem:[%s5021_s3 + $0x190] sm:$0xff] %v2408_v47  ;;  %v2106_v7 = vadd.f32 %v2105_v22, %v5015_v40  ;;  %v2252_v24 = vpop.f32.mrf.mxu2 }
 0x3eb   : > { %v2253_v43 = vadd.f32 %v2252_v24, %v5017_v32 }
 0x3ec   : > { %v2156_v59 = vpop.f32.mrf.mxu0  ;;  %v2406_v13 = vadd.f32 %v2341_v63, %v2106_v7 }
 0x3ed   : > { %v2157_v38 = vadd.f32 %v2156_v59, %v5009_v10  ;;  %v2205_v61 = vpop.f32.mrf.mxu1  ;;  %v2409_v30 = vadd.f32 %v2341_v63, %v2253_v43 }
 0x3ee   : > { %v2206_v34 = vadd.f32 %v2205_v61, %v5011_v12  ;;  %2470 = vst [vmem:[%s5021_s3 + $0x180] sm:$0xff] %v2406_v13 }
 0x3ef   : > { %v2411_v3 = vadd.f32 %v2346_v2, %v2157_v38  ;;  %2473 = vst [vmem:[%s5021_s3 + $0x198] sm:$0xff] %v2409_v30 }
 0x3f0   : > { %v2412_v6 = vadd.f32 %v2346_v2, %v2206_v34 }
 0x3f1   : > { %2475 = vst [vmem:[%s5021_s3 + $0x1a8] sm:$0xff] %v2411_v3  ;;  %v2107_v42 = vpop.f32.mrf.mxu3 }
 0x3f2   : > { %2476 = vst [vmem:[%s5021_s3 + $0x1b0] sm:$0xff] %v2412_v6  ;;  %v2108_v45 = vadd.f32 %v2107_v42, %v5015_v40  ;;  %v2254_v36 = vpop.f32.mrf.mxu2 }
 0x3f3   : > { %v2255_v0 = vadd.f32 %v2254_v36, %v5017_v32 }
 0x3f4   : > { %v2159_v23 = vpop.f32.mrf.mxu0  ;;  %v2410_v53 = vadd.f32 %v2346_v2, %v2108_v45 }
 0x3f5   : > { %v2160_v21 = vadd.f32 %v2159_v23, %v5009_v10  ;;  %v2208_v58 = vpop.f32.mrf.mxu1  ;;  %v2413_v11 = vadd.f32 %v2346_v2, %v2255_v0 }
 0x3f6   : > { %v2209_v29 = vadd.f32 %v2208_v58, %v5011_v12  ;;  %2474 = vst [vmem:[%s5021_s3 + $0x1a0] sm:$0xff] %v2410_v53 }
 0x3f7   : > { %v2415_v17 = vadd.f32 %v2351_v39, %v2160_v21  ;;  %2477 = vst [vmem:[%s5021_s3 + $0x1b8] sm:$0xff] %v2413_v11 }
 0x3f8   : > { %v2416_v51 = vadd.f32 %v2351_v39, %v2209_v29 }
 0x3f9   : > { %2479 = vst [vmem:[%s5021_s3 + $0x1c8] sm:$0xff] %v2415_v17  ;;  %v2110_v52 = vpop.f32.mrf.mxu3 }
 0x3fa   : > { %2480 = vst [vmem:[%s5021_s3 + $0x1d0] sm:$0xff] %v2416_v51  ;;  %v2111_v14 = vadd.f32 %v2110_v52, %v5015_v40  ;;  %v2257_v27 = vpop.f32.mrf.mxu2 }
 0x3fb   : > { %v2258_v56 = vadd.f32 %v2257_v27, %v5017_v32 }
 0x3fc   : > { %v2161_v5 = vpop.f32.mrf.mxu0  ;;  %v2414_v54 = vadd.f32 %v2351_v39, %v2111_v14 }
 0x3fd   : > { %v2162_v48 = vadd.f32 %v2161_v5, %v5009_v10  ;;  %v2210_v41 = vpop.f32.mrf.mxu1  ;;  %v2417_v15 = vadd.f32 %v2351_v39, %v2258_v56 }
 0x3fe   : > { %v2211_v16 = vadd.f32 %v2210_v41, %v5011_v12  ;;  %2478 = vst [vmem:[%s5021_s3 + $0x1c0] sm:$0xff] %v2414_v54 }
 0x3ff   : > { %v2419_v44 = vadd.f32 %v2356_v46, %v2162_v48  ;;  %2481 = vst [vmem:[%s5021_s3 + $0x1d8] sm:$0xff] %v2417_v15 }
 0x400   : > { %v2420_v20 = vadd.f32 %v2356_v46, %v2211_v16 }
 0x401   : > { %2483 = vst [vmem:[%s5021_s3 + $0x1e8] sm:$0xff] %v2419_v44  ;;  %v2112_v49 = vpop.f32.mrf.mxu3 }
 0x402   : > { %2484 = vst [vmem:[%s5021_s3 + $0x1f0] sm:$0xff] %v2420_v20  ;;  %v2113_v10 = vadd.f32 %v2112_v49, %v5015_v40  ;;  %v2259_v12 = vpop.f32.mrf.mxu2 }
 0x403   : > { %v2260_v4 = vadd.f32 %v2259_v12, %v5017_v32 }
 0x404   : > { %v2418_v26 = vadd.f32 %v2356_v46, %v2113_v10 }
 0x405   : > { %v2421_v1 = vadd.f32 %v2356_v46, %v2260_v4 }
 0x406   : > { %2482 = vst [vmem:[%s5021_s3 + $0x1e0] sm:$0xff] %v2418_v26 }
 0x407   : > { %2485 = vst [vmem:[%s5021_s3 + $0x1f8] sm:$0xff] %v2421_v1 }
 0x408   : > { %3646 = shalt.err (!%p3643_p4)
}
 0x409   : > { %s3719_s15 = smov 512   ;;  %s3720_s3 = smov 32  }
 0x40a   : > { %3217 = dma.vmem_to_hbm [thread:$0]  (%p3871_p0), %s2506_s24, 8192, %s2508_s27, %s2487_s23, %s3719_s15, %s3719_s15, %s3720_s3  }
 0x40b PF: > { %s2540_s22 = sand.u32 1, %s3689_s17   ;;  %p5367_p13 = scmp.ge.s32.totalorder %s3701_s20, 2 }
 0x40c   : > { %s2541_s5 = scalar_lea.sflag [#allocation4], %s2540_s22 }
 0x40d   : > { %p3242_p7 = pnand %p5367_p13, %p3877_p6 }
 0x40f   : > { %p3243_p8 = pneg %p3242_p7 }
 0x411   : > { %3680 = dma.done.wait (%p3243_p8), %s2541_s5, 8192  }
 0x412   : > { %3682 = vsyncadd (%p3243_p8), %s2541_s5, 4294959104  ;;  %s2551_s26 = scalar_lea.sflag [#allocation15], %s2540_s22 }
 0x413   : > { %3684 = dma.done.wait (%p3243_p8), %s2551_s26, 4096  }
 0x414   : > { %3686 = vsyncadd (%p3243_p8), %s2551_s26, 4294963200  ;;  %s5368_s30 = sld [smem:[#allocation22_spill]]  ;;  %p31_p0 = scmp.ge.s32.totalorder %s3847_s29, 4  }
 0x415   : > { %s5369_s17 = smov %s3693_s18  ;;  %s5370_s18 = smov %s3697_s19 }
 0x416   : > { %s5372_s20 = smov %s3847_s29  ;;  %33 = sbr.rel (!%p31_p0) target bundleno = 16 (0x10), region = 145 }
 0x41a   : > { %s5371_s19 = smov %s5368_s30 }
 0x41b   :  { %2557 = vsyncpa [#allocation3], 1 }
 0x41c   :  { %2559 = vsyncpa [#allocation3 + $0x1], 1 }
 0x41d   :  { %2560 = vsyncpa [#allocation6], 1 }
 0x41e   :  { %2561 = vsyncpa [#allocation9], 1 }
 0x41f   :  { %2562 = vsyncpa [#allocation12], 1 }
 0x420   :  { %2563 = vsyncpa [#allocation4], 1 }
 0x421   :  { %2565 = vsyncpa [#allocation4 + $0x1], 1 }
 0x422   :  { %2566 = vsyncpa [#allocation15], 1 }
 0x423   :  { %2568 = vsyncpa [#allocation15 + $0x1], 1 }

</bundles_post_ra>
